<compile_context>
chip_gen: v5e
topology: v5e:2x2
jax: 0.10.0
libtpu: 0.0.40
codegen_flags: <defaults>
</compile_context>

<pallas_src>
import functools

import jax
import jax.numpy as jnp
from jax.experimental import pallas as pl
from jax.experimental.pallas import tpu as pltpu

_BN_EPS = 1e-5
_LANE = 128
_VMEM_LIMIT = 48 * 1024 * 1024


# --------------------------------------------------------------------------
# Kernel
# --------------------------------------------------------------------------

def _conv_bn_relu_kernel(x_ref, w_ref, off_ref, o_ref, *scratch, kh, kw, dil,
                         h_out, w_out, relu, n_ci):
    """One (batch, cout-tile) output block.

    Sums the kh*kw conv taps (static unroll over shifted windows of the padded
    input) and, when the input channels are split (n_ci > 1), also accumulates
    over cin tiles (grid axis 2) in a float32 VMEM scratch.
    """
    m = h_out * w_out

    def tap_sum():
        x = x_ref[0]                                  # (Hp, Wp, c_blk) bf16
        acc = None
        for t in range(kh * kw):                      # static unroll over taps
            i, j = divmod(t, kw)
            win = x[i * dil:i * dil + h_out, j * dil:j * dil + w_out, :]
            a = win.reshape(m, win.shape[-1])
            contrib = jnp.dot(a, w_ref[t], preferred_element_type=jnp.float32)
            acc = contrib if acc is None else acc + contrib
        return acc

    def epilogue(y):
        y = y + off_ref[...]                          # BN offset / conv bias
        if relu:
            y = jnp.maximum(y, 0.0)
        return y.astype(o_ref.dtype)

    if n_ci == 1:
        # Common path: no channel split -> no accumulator scratch, fused store.
        o_ref[0] = epilogue(tap_sum())
    else:
        acc_ref, = scratch
        ci = pl.program_id(2)

        @pl.when(ci == 0)
        def _init():
            acc_ref[...] = jnp.zeros_like(acc_ref)

        acc_ref[...] += tap_sum()

        @pl.when(ci == n_ci - 1)
        def _finalize():
            o_ref[0] = epilogue(acc_ref[...])


def _round_up(v, m):
    return (v + m - 1) // m * m


# --------------------------------------------------------------------------
# Forward wrapper
# --------------------------------------------------------------------------

def convbnrelu_forward(x, weight, bias=None, bn=None, relu=True,
                       stride=1, padding=1, dilation=1, groups=1):
    """convbnrelu forward.  x: (N, Cin, H, W) NCHW, weight: (O, I, kh, kw)."""
    N, Cin, H, W = x.shape
    Cout, _, kh, kw = weight.shape

    if groups != 1:
        # Grouped conv: one pallas_call per group (fine for small g).
        cin_g, cout_g = Cin // groups, Cout // groups
        outs = []
        for g in range(groups):
            bg = None if bias is None else bias[g * cout_g:(g + 1) * cout_g]
            bng = None if bn is None else {k: v[g * cout_g:(g + 1) * cout_g]
                                           for k, v in bn.items()}
            outs.append(convbnrelu_forward(
                x[:, g * cin_g:(g + 1) * cin_g],
                weight[g * cout_g:(g + 1) * cout_g],
                bias=bg, bn=bng, relu=relu, stride=1,
                padding=padding, dilation=dilation, groups=1))
        out = jnp.concatenate(outs, axis=1)
    else:
        # Fold conv bias + inference BatchNorm into per-channel scale/offset;
        # scale is folded into the weights so the kernel epilogue is +offset.
        if bn is not None:
            scale = bn["gamma"] / jnp.sqrt(bn["var"] + _BN_EPS)
            offset = bn["beta"] - bn["mean"] * scale
            if bias is not None:
                offset = offset + bias * scale
        else:
            scale = jnp.ones((Cout,), jnp.float32)
            offset = bias if bias is not None else jnp.zeros((Cout,), jnp.float32)

        # ---- channel tiling ------------------------------------------------
        if Cin <= 512:
            c_blk, Cin_p = Cin, Cin
        else:
            c_blk = 256
            Cin_p = _round_up(Cin, c_blk)
        n_ci = Cin_p // c_blk

        Cout_p = _round_up(Cout, _LANE)
        tn = _LANE
        n_co = Cout_p // tn

        # ---- weights: (O,I,kh,kw) -> (kh*kw, Cin_p, Cout_p), scale folded, bf16
        wm = jnp.transpose(weight, (2, 3, 1, 0)).reshape(kh * kw, Cin, Cout)
        wm = wm * scale[None, None, :]
        wm = jnp.pad(wm, ((0, 0), (0, Cin_p - Cin), (0, Cout_p - Cout)))
        wm = wm.astype(jnp.bfloat16)
        off_p = jnp.pad(offset.astype(jnp.float32),
                        (0, Cout_p - Cout)).reshape(1, Cout_p)

        # ---- input: NCHW -> NHWC, zero-pad spatial + channels, bf16 ----------
        xh = jnp.transpose(x, (0, 2, 3, 1))
        xh = jnp.pad(xh, ((0, 0), (padding, padding), (padding, padding),
                          (0, Cin_p - Cin))).astype(jnp.bfloat16)
        Hp, Wp = H + 2 * padding, W + 2 * padding
        h_out = Hp - dilation * (kh - 1)
        w_out = Wp - dilation * (kw - 1)
        m_img = h_out * w_out

        kern = functools.partial(_conv_bn_relu_kernel, kh=kh, kw=kw,
                                 dil=dilation, h_out=h_out, w_out=w_out,
                                 relu=relu, n_ci=n_ci)

        if n_ci == 1:
            grid = (N, n_co)
            in_specs = [
                pl.BlockSpec((1, Hp, Wp, c_blk), lambda n, co: (n, 0, 0, 0)),
                pl.BlockSpec((kh * kw, c_blk, tn), lambda n, co: (0, 0, co)),
                pl.BlockSpec((1, tn), lambda n, co: (0, co)),
            ]
            out_specs = pl.BlockSpec((1, m_img, tn), lambda n, co: (n, 0, co))
            scratch_shapes = []
            dim_sem = ("parallel", "parallel")
        else:
            grid = (N, n_co, n_ci)
            in_specs = [
                pl.BlockSpec((1, Hp, Wp, c_blk), lambda n, co, ci: (n, 0, 0, ci)),
                pl.BlockSpec((kh * kw, c_blk, tn), lambda n, co, ci: (0, ci, co)),
                pl.BlockSpec((1, tn), lambda n, co, ci: (0, co)),
            ]
            out_specs = pl.BlockSpec((1, m_img, tn), lambda n, co, ci: (n, 0, co))
            scratch_shapes = [pltpu.VMEM((m_img, tn), jnp.float32)]
            dim_sem = ("parallel", "parallel", "arbitrary")

        out = pl.pallas_call(
            kern,
            out_shape=jax.ShapeDtypeStruct((N, m_img, Cout_p), jnp.float32),
            grid_spec=pltpu.PrefetchScalarGridSpec(
                num_scalar_prefetch=0,
                grid=grid,
                in_specs=in_specs,
                out_specs=out_specs,
                scratch_shapes=scratch_shapes,
            ),
            compiler_params=pltpu.CompilerParams(
                dimension_semantics=dim_sem,
                vmem_limit_bytes=_VMEM_LIMIT),
        )(xh, wm, off_p)

        out = out.reshape(N, h_out, w_out, Cout_p)[:, :, :, :Cout]
        out = jnp.transpose(out, (0, 3, 1, 2))          # back to NCHW

    if stride != 1:
        # TODO(synk): stride>1 is realized as stride-1 conv + subsample
        # (correct but wastes s^2 compute); a strided in-kernel window slice
        # would avoid it.
        out = out[:, :, ::stride, ::stride]
    return out


# --------------------------------------------------------------------------
# Pure-XLA reference (same bf16-rounded operands -> tight tolerance)
# --------------------------------------------------------------------------

def _reference(x, weight, bias, bn, relu, padding, dilation):
    Cout = weight.shape[0]
    if bn is not None:
        scale = bn["gamma"] / jnp.sqrt(bn["var"] + _BN_EPS)
        offset = bn["beta"] - bn["mean"] * scale
        if bias is not None:
            offset = offset + bias * scale
    else:
        scale = jnp.ones((Cout,), jnp.float32)
        offset = bias if bias is not None else jnp.zeros((Cout,), jnp.float32)
    wf = (weight * scale[:, None, None, None]).astype(jnp.bfloat16).astype(jnp.float32)
    xf = x.astype(jnp.bfloat16).astype(jnp.float32)
    y = jax.lax.conv_general_dilated(
        xf, wf, window_strides=(1, 1),
        padding=[(padding, padding), (padding, padding)],
        rhs_dilation=(dilation, dilation),
        dimension_numbers=("NCHW", "OIHW", "NCHW"),
        precision=jax.lax.Precision.HIGHEST)
    y = y + offset[None, :, None, None]
    if relu:
        y = jnp.maximum(y, 0.0)
    return y


# --------------------------------------------------------------------------
# Main
# --------------------------------------------------------------------------

if __name__ == "__main__":
    key = jax.random.PRNGKey(0)
    k_x, k_w, k_g, k_b, k_m, k_v, k_x2, k_w2, k_b2 = jax.random.split(key, 9)

    # Config 1: module defaults -- k=3, s=1, p=1, d=1, bias=False, bn=True, relu=True.
    N, Cin, H, W, Cout = 2, 64, 16, 16, 96
    x = jax.random.normal(k_x, (N, Cin, H, W), jnp.float32)
    w = jax.random.normal(k_w, (Cout, Cin, 3, 3), jnp.float32) * 0.05
    bn = dict(
        gamma=jax.random.uniform(k_g, (Cout,), jnp.float32, 0.5, 1.5),
        beta=jax.random.normal(k_b, (Cout,), jnp.float32) * 0.1,
        mean=jax.random.normal(k_m, (Cout,), jnp.float32) * 0.1,
        var=jax.random.uniform(k_v, (Cout,), jnp.float32, 0.5, 1.5),
    )
    run1 = jax.jit(functools.partial(convbnrelu_forward, relu=True,
                                     stride=1, padding=1, dilation=1))
    out1 = jax.block_until_ready(run1(x, w, None, bn))
    ref1 = jax.block_until_ready(_reference(x, w, None, bn, True, 1, 1))
    assert out1.shape == (N, Cout, H, W), out1.shape
    assert bool(jnp.all(jnp.isfinite(out1)))
    assert bool(jnp.allclose(out1, ref1, atol=1e-2, rtol=1e-2)), \
        float(jnp.max(jnp.abs(out1 - ref1)))

    # Config 2: dilation=2, pad=2, conv bias, no BN, no ReLU.
    Cin2, Cout2 = 32, 64
    x2 = jax.random.normal(k_x2, (N, Cin2, H, W), jnp.float32)
    w2 = jax.random.normal(k_w2, (Cout2, Cin2, 3, 3), jnp.float32) * 0.05
    b2 = jax.random.normal(k_b2, (Cout2,), jnp.float32) * 0.1
    run2 = jax.jit(functools.partial(convbnrelu_forward, relu=False,
                                     stride=1, padding=2, dilation=2))
    out2 = jax.block_until_ready(run2(x2, w2, b2, None))
    ref2 = jax.block_until_ready(_reference(x2, w2, b2, None, False, 2, 2))
    assert out2.shape == (N, Cout2, H, W), out2.shape
    assert bool(jnp.allclose(out2, ref2, atol=1e-2, rtol=1e-2)), \
        float(jnp.max(jnp.abs(out2 - ref2)))

    print("KERNEL_OK")
</pallas_src>

<mosaic_0001>
module attributes {stable_mosaic.version = 11 : i64} {
  func.func @_conv_bn_relu_kernel(%arg0: i32, %arg1: i32, %arg2: memref<1x18x18x64xbf16, #tpu.memory_space<vmem>>, %arg3: memref<9x64x128xbf16, #tpu.memory_space<vmem>>, %arg4: memref<1x128xf32, #tpu.memory_space<vmem>>, %arg5: memref<1x256x128xf32, #tpu.memory_space<vmem>>) attributes {dimension_semantics = [#tpu.dimension_semantics<parallel>, #tpu.dimension_semantics<parallel>], iteration_bounds = array<i64: 2, 1>, scalar_prefetch = 0 : i64, scratch_operands = 0 : i64, tpu.core_type = #tpu.core_type<tc>, window_params = [{transform_indices = @transform_0, window_bounds = array<i64: 1, 18, 18, 64>}, {transform_indices = @transform_1, window_bounds = array<i64: 9, 64, 128>}, {transform_indices = @transform_2, window_bounds = array<i64: 1, 128>}, {transform_indices = @transform_3, window_bounds = array<i64: 1, 256, 128>}]} {
    %c0 = arith.constant 0 : index
    %c0_0 = arith.constant 0 : index
    %c0_1 = arith.constant 0 : index
    %c0_2 = arith.constant 0 : index
    %0 = vector.load %arg2[%c0, %c0_0, %c0_1, %c0_2] : memref<1x18x18x64xbf16, #tpu.memory_space<vmem>>, vector<1x18x18x64xbf16>
    %1 = vector.shape_cast %0 : vector<1x18x18x64xbf16> to vector<18x18x64xbf16>
    %2 = vector.extract_strided_slice %1 {offsets = [0, 0, 0], sizes = [16, 16, 64], strides = [1, 1, 1]} : vector<18x18x64xbf16> to vector<16x16x64xbf16>
    %3 = vector.shape_cast %2 : vector<16x16x64xbf16> to vector<256x64xbf16>
    %c0_3 = arith.constant 0 : index
    %c0_4 = arith.constant 0 : index
    %c0_5 = arith.constant 0 : index
    %4 = vector.load %arg3[%c0_3, %c0_4, %c0_5] : memref<9x64x128xbf16, #tpu.memory_space<vmem>>, vector<1x64x128xbf16>
    %5 = vector.shape_cast %4 : vector<1x64x128xbf16> to vector<64x128xbf16>
    %cst = arith.constant dense<0.000000e+00> : vector<256x128xf32>
    %6 = tpu.matmul %3, %5, %cst {dimension_numbers = #tpu.dot_dimension_numbers<[1], [0], [0], [1], [0, 0, 1, 1], [], []>} : vector<256x64xbf16>, vector<64x128xbf16>, vector<256x128xf32> -> vector<256x128xf32>
    %7 = vector.extract_strided_slice %1 {offsets = [0, 1, 0], sizes = [16, 16, 64], strides = [1, 1, 1]} : vector<18x18x64xbf16> to vector<16x16x64xbf16>
    %8 = vector.shape_cast %7 : vector<16x16x64xbf16> to vector<256x64xbf16>
    %c1 = arith.constant 1 : index
    %c0_6 = arith.constant 0 : index
    %c0_7 = arith.constant 0 : index
    %9 = vector.load %arg3[%c1, %c0_6, %c0_7] : memref<9x64x128xbf16, #tpu.memory_space<vmem>>, vector<1x64x128xbf16>
    %10 = vector.shape_cast %9 : vector<1x64x128xbf16> to vector<64x128xbf16>
    %cst_8 = arith.constant dense<0.000000e+00> : vector<256x128xf32>
    %11 = tpu.matmul %8, %10, %cst_8 {dimension_numbers = #tpu.dot_dimension_numbers<[1], [0], [0], [1], [0, 0, 1, 1], [], []>} : vector<256x64xbf16>, vector<64x128xbf16>, vector<256x128xf32> -> vector<256x128xf32>
    %12 = arith.addf %6, %11 : vector<256x128xf32>
    %13 = vector.extract_strided_slice %1 {offsets = [0, 2, 0], sizes = [16, 16, 64], strides = [1, 1, 1]} : vector<18x18x64xbf16> to vector<16x16x64xbf16>
    %14 = vector.shape_cast %13 : vector<16x16x64xbf16> to vector<256x64xbf16>
    %c2 = arith.constant 2 : index
    %c0_9 = arith.constant 0 : index
    %c0_10 = arith.constant 0 : index
    %15 = vector.load %arg3[%c2, %c0_9, %c0_10] : memref<9x64x128xbf16, #tpu.memory_space<vmem>>, vector<1x64x128xbf16>
    %16 = vector.shape_cast %15 : vector<1x64x128xbf16> to vector<64x128xbf16>
    %cst_11 = arith.constant dense<0.000000e+00> : vector<256x128xf32>
    %17 = tpu.matmul %14, %16, %cst_11 {dimension_numbers = #tpu.dot_dimension_numbers<[1], [0], [0], [1], [0, 0, 1, 1], [], []>} : vector<256x64xbf16>, vector<64x128xbf16>, vector<256x128xf32> -> vector<256x128xf32>
    %18 = arith.addf %12, %17 : vector<256x128xf32>
    %19 = vector.extract_strided_slice %1 {offsets = [1, 0, 0], sizes = [16, 16, 64], strides = [1, 1, 1]} : vector<18x18x64xbf16> to vector<16x16x64xbf16>
    %20 = vector.shape_cast %19 : vector<16x16x64xbf16> to vector<256x64xbf16>
    %c3 = arith.constant 3 : index
    %c0_12 = arith.constant 0 : index
    %c0_13 = arith.constant 0 : index
    %21 = vector.load %arg3[%c3, %c0_12, %c0_13] : memref<9x64x128xbf16, #tpu.memory_space<vmem>>, vector<1x64x128xbf16>
    %22 = vector.shape_cast %21 : vector<1x64x128xbf16> to vector<64x128xbf16>
    %cst_14 = arith.constant dense<0.000000e+00> : vector<256x128xf32>
    %23 = tpu.matmul %20, %22, %cst_14 {dimension_numbers = #tpu.dot_dimension_numbers<[1], [0], [0], [1], [0, 0, 1, 1], [], []>} : vector<256x64xbf16>, vector<64x128xbf16>, vector<256x128xf32> -> vector<256x128xf32>
    %24 = arith.addf %18, %23 : vector<256x128xf32>
    %25 = vector.extract_strided_slice %1 {offsets = [1, 1, 0], sizes = [16, 16, 64], strides = [1, 1, 1]} : vector<18x18x64xbf16> to vector<16x16x64xbf16>
    %26 = vector.shape_cast %25 : vector<16x16x64xbf16> to vector<256x64xbf16>
    %c4 = arith.constant 4 : index
    %c0_15 = arith.constant 0 : index
    %c0_16 = arith.constant 0 : index
    %27 = vector.load %arg3[%c4, %c0_15, %c0_16] : memref<9x64x128xbf16, #tpu.memory_space<vmem>>, vector<1x64x128xbf16>
    %28 = vector.shape_cast %27 : vector<1x64x128xbf16> to vector<64x128xbf16>
    %cst_17 = arith.constant dense<0.000000e+00> : vector<256x128xf32>
    %29 = tpu.matmul %26, %28, %cst_17 {dimension_numbers = #tpu.dot_dimension_numbers<[1], [0], [0], [1], [0, 0, 1, 1], [], []>} : vector<256x64xbf16>, vector<64x128xbf16>, vector<256x128xf32> -> vector<256x128xf32>
    %30 = arith.addf %24, %29 : vector<256x128xf32>
    %31 = vector.extract_strided_slice %1 {offsets = [1, 2, 0], sizes = [16, 16, 64], strides = [1, 1, 1]} : vector<18x18x64xbf16> to vector<16x16x64xbf16>
    %32 = vector.shape_cast %31 : vector<16x16x64xbf16> to vector<256x64xbf16>
    %c5 = arith.constant 5 : index
    %c0_18 = arith.constant 0 : index
    %c0_19 = arith.constant 0 : index
    %33 = vector.load %arg3[%c5, %c0_18, %c0_19] : memref<9x64x128xbf16, #tpu.memory_space<vmem>>, vector<1x64x128xbf16>
    %34 = vector.shape_cast %33 : vector<1x64x128xbf16> to vector<64x128xbf16>
    %cst_20 = arith.constant dense<0.000000e+00> : vector<256x128xf32>
    %35 = tpu.matmul %32, %34, %cst_20 {dimension_numbers = #tpu.dot_dimension_numbers<[1], [0], [0], [1], [0, 0, 1, 1], [], []>} : vector<256x64xbf16>, vector<64x128xbf16>, vector<256x128xf32> -> vector<256x128xf32>
    %36 = arith.addf %30, %35 : vector<256x128xf32>
    %37 = vector.extract_strided_slice %1 {offsets = [2, 0, 0], sizes = [16, 16, 64], strides = [1, 1, 1]} : vector<18x18x64xbf16> to vector<16x16x64xbf16>
    %38 = vector.shape_cast %37 : vector<16x16x64xbf16> to vector<256x64xbf16>
    %c6 = arith.constant 6 : index
    %c0_21 = arith.constant 0 : index
    %c0_22 = arith.constant 0 : index
    %39 = vector.load %arg3[%c6, %c0_21, %c0_22] : memref<9x64x128xbf16, #tpu.memory_space<vmem>>, vector<1x64x128xbf16>
    %40 = vector.shape_cast %39 : vector<1x64x128xbf16> to vector<64x128xbf16>
    %cst_23 = arith.constant dense<0.000000e+00> : vector<256x128xf32>
    %41 = tpu.matmul %38, %40, %cst_23 {dimension_numbers = #tpu.dot_dimension_numbers<[1], [0], [0], [1], [0, 0, 1, 1], [], []>} : vector<256x64xbf16>, vector<64x128xbf16>, vector<256x128xf32> -> vector<256x128xf32>
    %42 = arith.addf %36, %41 : vector<256x128xf32>
    %43 = vector.extract_strided_slice %1 {offsets = [2, 1, 0], sizes = [16, 16, 64], strides = [1, 1, 1]} : vector<18x18x64xbf16> to vector<16x16x64xbf16>
    %44 = vector.shape_cast %43 : vector<16x16x64xbf16> to vector<256x64xbf16>
    %c7 = arith.constant 7 : index
    %c0_24 = arith.constant 0 : index
    %c0_25 = arith.constant 0 : index
    %45 = vector.load %arg3[%c7, %c0_24, %c0_25] : memref<9x64x128xbf16, #tpu.memory_space<vmem>>, vector<1x64x128xbf16>
    %46 = vector.shape_cast %45 : vector<1x64x128xbf16> to vector<64x128xbf16>
    %cst_26 = arith.constant dense<0.000000e+00> : vector<256x128xf32>
    %47 = tpu.matmul %44, %46, %cst_26 {dimension_numbers = #tpu.dot_dimension_numbers<[1], [0], [0], [1], [0, 0, 1, 1], [], []>} : vector<256x64xbf16>, vector<64x128xbf16>, vector<256x128xf32> -> vector<256x128xf32>
    %48 = arith.addf %42, %47 : vector<256x128xf32>
    %49 = vector.extract_strided_slice %1 {offsets = [2, 2, 0], sizes = [16, 16, 64], strides = [1, 1, 1]} : vector<18x18x64xbf16> to vector<16x16x64xbf16>
    %50 = vector.shape_cast %49 : vector<16x16x64xbf16> to vector<256x64xbf16>
    %c8 = arith.constant 8 : index
    %c0_27 = arith.constant 0 : index
    %c0_28 = arith.constant 0 : index
    %51 = vector.load %arg3[%c8, %c0_27, %c0_28] : memref<9x64x128xbf16, #tpu.memory_space<vmem>>, vector<1x64x128xbf16>
    %52 = vector.shape_cast %51 : vector<1x64x128xbf16> to vector<64x128xbf16>
    %cst_29 = arith.constant dense<0.000000e+00> : vector<256x128xf32>
    %53 = tpu.matmul %50, %52, %cst_29 {dimension_numbers = #tpu.dot_dimension_numbers<[1], [0], [0], [1], [0, 0, 1, 1], [], []>} : vector<256x64xbf16>, vector<64x128xbf16>, vector<256x128xf32> -> vector<256x128xf32>
    %54 = arith.addf %48, %53 : vector<256x128xf32>
    %c0_30 = arith.constant 0 : index
    %c0_31 = arith.constant 0 : index
    %55 = vector.load %arg4[%c0_30, %c0_31] : memref<1x128xf32, #tpu.memory_space<vmem>>, vector<1x128xf32>
    %56 = vector.broadcast %55 : vector<1x128xf32> to vector<256x128xf32>
    %57 = arith.addf %54, %56 : vector<256x128xf32>
    %cst_32 = arith.constant 0.000000e+00 : f32
    %58 = vector.broadcast %cst_32 : f32 to vector<256x128xf32>
    %59 = arith.maximumf %57, %58 : vector<256x128xf32>
    %c0_33 = arith.constant 0 : index
    %c0_34 = arith.constant 0 : index
    %c0_35 = arith.constant 0 : index
    %60 = vector.load %arg5[%c0_33, %c0_34, %c0_35] : memref<1x256x128xf32, #tpu.memory_space<vmem>>, vector<1x256x128xf32>
    %61 = vector.shape_cast %60 : vector<1x256x128xf32> to vector<256x128xf32>
    %62 = vector.shape_cast %59 : vector<256x128xf32> to vector<1x256x128xf32>
    tpu.vector_store %arg5[%c0_33, %c0_34, %c0_35], %62 {strides = array<i32>} : memref<1x256x128xf32, #tpu.memory_space<vmem>>, vector<1x256x128xf32>,
    return
  }
  func.func @transform_0(%arg0: i32, %arg1: i32) -> (i32, i32, i32, i32) {
    %c0_i32 = arith.constant 0 : i32
    %c0_i32_0 = arith.constant 0 : i32
    %c0_i32_1 = arith.constant 0 : i32
    %c0_i32_2 = arith.constant 0 : i32
    return %arg0, %c0_i32, %c0_i32_0, %c0_i32_1 : i32, i32, i32, i32
  }
  func.func @transform_1(%arg0: i32, %arg1: i32) -> (i32, i32, i32) {
    %c0_i32 = arith.constant 0 : i32
    %c0_i32_0 = arith.constant 0 : i32
    %c0_i32_1 = arith.constant 0 : i32
    return %c0_i32, %c0_i32_0, %arg1 : i32, i32, i32
  }
  func.func @transform_2(%arg0: i32, %arg1: i32) -> (i32, i32) {
    %c0_i32 = arith.constant 0 : i32
    %c0_i32_0 = arith.constant 0 : i32
    return %c0_i32, %arg1 : i32, i32
  }
  func.func @transform_3(%arg0: i32, %arg1: i32) -> (i32, i32, i32) {
    %c0_i32 = arith.constant 0 : i32
    %c0_i32_0 = arith.constant 0 : i32
    return %arg0, %c0_i32, %arg1 : i32, i32, i32
  }
}

</mosaic_0001>

<bundles_post_ra>
// kernel: convbnrelu_forward.1
= control target key start
LH: loop header
LB: loop body
LE: loop exit
PB: predicated region body
PF: predicated region fallthrough
CT: control target
= control target key end

     0   :  { %s3346_s12 = smov 0   ;;  %s3348_s13 = smov 0   ;;  %s4567_s0 = inlined_call_operand.vmem [shape: bf16[2,18,18,64], index: 0, kind: input, shape index: {}]   ;;  %s4568_s1 = inlined_call_operand.vmem [shape: bf16[9,64,128], index: 1, kind: input, shape index: {}]   ;;  %s4569_s2 = inlined_call_operand.vmem [shape: f32[1,128], index: 2, kind: input, shape index: {}]   ;;  %s4570_s3 = inlined_call_operand.vmem [shape: f32[2,256,128], index: 3, kind: output, shape index: {}]  }
   0x1   :  { %s3350_s14 = smov 0  }
   0x2 LB: > { %s25_s15 = sadd.s32 1, %s3320_s13  ;;  %p2752_p0 = scmp.ge.s32.totalorder %s3324_s14, 1  ;;  %s3324_s14 = sphi %s3350_s14, %s13_s14   ;;  %s3320_s13 = sphi %s3348_s13, %s4713_s13   ;;  %s3316_s12 = sphi %s3346_s12, %s4712_s12  }
   0x3   : > { %p27_p1 = scmp.ge.s32.totalorder %s25_s15, 2  ;;  %p168_p2 = scmp.lt.s32.totalorder %s3324_s14, 3 }
   0x5   : > { %s4715_s15 = smov (%p27_p1, %s25_s15), 0  ;;  %p169_p3 = pnand %p2752_p0, %p168_p2 }
   0x7   : > { %172 = sbr.rel (%p169_p3) target bundleno = 759 (0x2f7), region = 32 }
   0xc   : > { %v3226_v0 = vld [vmem:[%s4568_s1 + $0x38] sm:$0xff]  ;;  %p202_p4 = scmp.lt.s32.totalorder %s3316_s12, 1  ;;  %v3225_v1 = vld [vmem:[%s4568_s1 + $0x30] sm:$0xff]  ;;  %v3224_v2 = vld [vmem:[%s4568_s1 + $0x28] sm:$0xff]  ;;  %vm285_vm0 = vsmask.f32 3328 }
   0xd   : > { %3255 = vmatpush.bf16.msra.mxu1 %v3226_v0  ;;  %3256 = vmatpush.bf16.msra.mxu2 %v3226_v0  ;;  %vm286_vm1 = vsmask.f32 7440  ;;  %v3223_v6 = vld [vmem:[%s4568_s1 + $0x20] sm:$0xff]  ;;  %v3230_v30 = vld [vmem:[%s4568_s1 + $0x58] sm:$0xff]  ;;  %vm753_vm3 = vcmask 523264   ;;  %vm1148_vm4 = vcmask 1042432  }
   0xe   : > { %s4717_s12 = smov (!%p202_p4, %s3316_s12), 1  ;;  %3257 = vmatpush.bf16.msra.mxu3 %v3226_v0  ;;  %806 = vmatpush.bf16.msra.mxu0 %v3226_v0  ;;  %v3234_v31 = vld [vmem:[%s4568_s1 + $0x78] sm:$0xff]  ;;  %vm3411_vm2 = vmor %vm285_vm0, %vm286_vm1  ;;  %vm1149_vm5 = vcmask 1046532  }
   0xf   : > { %s3267_s20 = smul.u32 216, %s4717_s12  ;;  %v3222_v36 = vld [vmem:[%s4568_s1 + $0x18] sm:$0xff]  ;;  %vm3755_vm6 = vmor %vm1148_vm4, %vm1149_vm5  ;;  %s3200_s28 = sshll.u32 %s4717_s12, 8 }
  0x10   : > { %v3238_v37 = vld [vmem:[%s4568_s1 + $0x98] sm:$0xff]  ;;  %s4385_s4 = scalar_lea.vmem %s4570_s3, %s3200_s28 }
  0x11   : > { %3258 = vmatpush.bf16.msra.mxu1 %v3225_v1  ;;  %3259 = vmatpush.bf16.msra.mxu2 %v3225_v1  ;;  %s3379_s25 = scalar_lea.vmem %s4567_s0, %s3267_s20 }
  0x12   : > { %3260 = vmatpush.bf16.msra.mxu3 %v3225_v1  ;;  %807 = vmatpush.bf16.msra.mxu0 %v3225_v1  ;;  %v3382_v3 = vld [vmem:[%s3379_s25 + $0x30] sm:$0xf]  ;;  %v3385_v4 = vld [vmem:[%s3379_s25 + $0x34] sm:$0xf]  ;;  %v3388_v5 = vld [vmem:[%s3379_s25 + $0x38] sm:$0x1] }
  0x13   : > { %v385_v7 = vshrl.u32 %v3382_v3, 16  ;;  %v388_v8 = vshll.u32 %v3382_v3, 16  ;;  %v394_v9 = vshll.u32 %v3385_v4, 16  ;;  %v398_v10 = vshrl.u32 %v3385_v4, 16  ;;  %v247_v11 = vld [vmem:[%s3379_s25 + $0x60] sm:$0xf] }
  0x14   : > { %v404_v12 = vshll.u32 %v3388_v5, 16  ;;  %v248_v13 = vld [vmem:[%s3379_s25 + $0x64] sm:$0xf]  ;;  %v249_v14 = vld [vmem:[%s3379_s25 + $0x68] sm:$0x1]  ;;  %v481_v15 = vshrl.u32 %v247_v11, 16 }
  0x15   : > { %3261 = vmatpush.bf16.msra.mxu1 %v3224_v2  ;;  %3262 = vmatpush.bf16.msra.mxu2 %v3224_v2  ;;  %v387_v16 = vrot.slane %v385_v7, 4  ;;  %v390_v17 = vrot.slane %v388_v8, 5  ;;  %v396_v18 = vrot.slane %v394_v9, 5  ;;  %v400_v19 = vrot.slane %v398_v10, 4  ;;  %v259_v20 = vld [vmem:[%s3379_s25 + $0x90] sm:$0xf] }
  0x16   : > { %3263 = vmatpush.bf16.msra.mxu3 %v3224_v2  ;;  %808 = vmatpush.bf16.msra.mxu0 %v3224_v2  ;;  %v406_v21 = vrot.slane %v404_v12, 5  ;;  %v483_v22 = vrot.slane %v481_v15, 4  ;;  %v484_v23 = vshll.u32 %v247_v11, 16  ;;  %v490_v24 = vshll.u32 %v248_v13, 16  ;;  %v260_v29 = vld [vmem:[%s3379_s25 + $0x94] sm:$0xf] }
  0x17   : > { %v391_v25 = vor.u32 %v390_v17, %v387_v16  ;;  %v401_v26 = vor.u32 %v400_v19, %v396_v18  ;;  %v494_v27 = vshrl.u32 %v248_v13, 16  ;;  %v500_v28 = vshll.u32 %v249_v14, 16  ;;  %v261_v43 = vld [vmem:[%s3379_s25 + $0x98] sm:$0x1]  ;;  %v3427_v59 = vld [vmem:[%s3379_s25] sm:$0xf] }
  0x18   : > { %v486_v33 = vrot.slane %v484_v23, 5  ;;  %v492_v34 = vrot.slane %v490_v24, 5  ;;  %v577_v35 = vshrl.u32 %v259_v20, 16  ;;  %v580_v45 = vshll.u32 %v259_v20, 16  ;;  %v3434_v63 = vld [vmem:[%s3379_s25 + $0x4] sm:$0xf] }
  0x19   : > { %3264 = vmatpush.bf16.msra.mxu1 %v3223_v6  ;;  %3265 = vmatpush.bf16.msra.mxu2 %v3223_v6  ;;  %v392_v38 = vrot.slane %v391_v25, 4  ;;  %v402_v39 = vrot.slane %v401_v26, 4  ;;  %v496_v40 = vrot.slane %v494_v27, 4  ;;  %v502_v41 = vrot.slane %v500_v28, 5  ;;  %v3437_v0 = vld [vmem:[%s3379_s25 + $0x8] sm:$0x1] }
  0x1a   : > { %3266 = vmatpush.bf16.msra.mxu3 %v3223_v6  ;;  %809 = vmatpush.bf16.msra.mxu0 %v3223_v6  ;;  %v487_v42 = vor.u32 %v486_v33, %v483_v22  ;;  %v579_v44 = vrot.slane %v577_v35, 4  ;;  %v586_v46 = vshll.u32 %v260_v29, 16  ;;  %v590_v50 = vshrl.u32 %v260_v29, 16  ;;  %v3229_v1 = vld [vmem:[%s4568_s1 + $0x50] sm:$0xff]  ;;  %v3449_v13 = vld [vmem:[%s3379_s25 + $0x3c] sm:$0xf] }
  0x1b   : > { %v397_v47 = vsel %vm3411_vm2, %v392_v38, %v396_v18  ;;  %v407_v48 = vsel %vm3411_vm2, %v402_v39, %v406_v21  ;;  %v497_v49 = vor.u32 %v496_v40, %v492_v34  ;;  %v582_v54 = vrot.slane %v580_v45, 5  ;;  %v3455_v18 = vld [vmem:[%s3379_s25 + $0x40] sm:$0xf]  ;;  %v3233_v23 = vld [vmem:[%s4568_s1 + $0x70] sm:$0xff]  ;;  %v3481_v39 = vld [vmem:[%s3379_s25 + $0x6c] sm:$0xf] }
  0x1c   : > { %v689_v51 = vunpack.c.l.b16 %v397_v47  ;;  %v690_v52 = vunpack.c.l.b16 %v407_v48  ;;  %v488_v53 = vrot.slane %v487_v42, 4  ;;  %v588_v56 = vrot.slane %v586_v46, 5  ;;  %v3221_v24 = vld [vmem:[%s4568_s1 + $0x10] sm:$0xff] }
  0x1d   : > { %1396 = vmatpush.bf16.msrb.mxu2 %v3230_v30  ;;  %1047 = vmatpush.bf16.msrb.mxu1 %v3222_v36  ;;  %v498_v55 = vrot.slane %v497_v49, 4  ;;  %v592_v57 = vrot.slane %v590_v50, 4  ;;  %v596_v58 = vshll.u32 %v261_v43, 16  ;;  %v583_v62 = vor.u32 %v582_v54, %v579_v44  ;;  %v3237_v25 = vld [vmem:[%s4568_s1 + $0x90] sm:$0xff]  ;;  %v3473_v30 = vld [vmem:[%s3379_s25 + $0x44] sm:$0x1] }
  0x1e   : > { %1558 = vmatpush.bf16.msrb.mxu3 %v3234_v31  ;;  %1742 = vmatpush.bf16.msrb.mxu0 %v3238_v37  ;;  %v3429_v60 = vpack.c.b16 %v690_v52, %v689_v51  ;;  %v493_v61 = vsel %vm3411_vm2, %v488_v53, %v492_v34  ;;  %v289_v11 = vshrl.u32 %v3427_v59, 16  ;;  %v292_v12 = vshll.u32 %v3427_v59, 16  ;;  %v3488_v48 = vld [vmem:[%s3379_s25 + $0x70] sm:$0xf]  ;;  %v3495_v52 = vld [vmem:[%s3379_s25 + $0x74] sm:$0x1] }
  0x1f   : > { %v503_v2 = vsel %vm3411_vm2, %v498_v55, %v502_v41  ;;  %v697_v6 = vunpack.c.l.b16 %v493_v61  ;;  %v593_v7 = vor.u32 %v592_v57, %v588_v56  ;;  %v598_v8 = vrot.slane %v596_v58, 5 }
  0x20   : > { %2784 = vmatmul.msk.bf16.vlgmr.msra.gmra.mxu1 %vm753_vm3, %v3429_v60  ;;  %v698_v9 = vunpack.c.l.b16 %v503_v2  ;;  %v584_v10 = vrot.slane %v583_v62, 4  ;;  %v298_v15 = vshll.u32 %v3434_v63, 16  ;;  %v302_v16 = vshrl.u32 %v3434_v63, 16 }
  0x21   : > { %1397 = vmatpush.bf16.msrb.mxu2 %v3229_v1  ;;  %v594_v14 = vrot.slane %v593_v7, 4  ;;  %v308_v17 = vshll.u32 %v3437_v0, 16  ;;  %v291_v21 = vrot.slane %v289_v11, 4  ;;  %v294_v22 = vrot.slane %v292_v12, 5  ;;  %1048 = vmatpush.bf16.msrb.mxu1 %v3221_v24 }
  0x22   : > { %v3457_v19 = vpack.c.b16 %v698_v9, %v697_v6  ;;  %v589_v20 = vsel %vm3411_vm2, %v584_v10, %v588_v56  ;;  %v300_v28 = vrot.slane %v298_v15, 5  ;;  %v304_v29 = vrot.slane %v302_v16, 4  ;;  %1559 = vmatpush.bf16.msrb.mxu3 %v3233_v23  ;;  %1743 = vmatpush.bf16.msrb.mxu0 %v3237_v25  ;;  %v262_v9 = vld [vmem:[%s3379_s25 + $0x9c] sm:$0xf] }
  0x23   : > { %v599_v26 = vsel %vm3411_vm2, %v594_v14, %v598_v8  ;;  %v705_v27 = vunpack.c.l.b16 %v589_v20  ;;  %v295_v33 = vor.u32 %v294_v22, %v291_v21  ;;  %v310_v34 = vrot.slane %v308_v17, 5  ;;  %v263_v14 = vld [vmem:[%s3379_s25 + $0xa0] sm:$0xf]  ;;  %v264_v21 = vld [vmem:[%s3379_s25 + $0xa4] sm:$0x1] }
  0x24   : > { %4613 = vst [vmem:[#allocation2_spill] sm:$0xff] %v3457_v19  ;;  %2788 = vmatmul.msk.bf16.vlgmr.msra.gmra.mxu2 %vm753_vm3, %v3457_v19  ;;  %v706_v31 = vunpack.c.l.b16 %v599_v26  ;;  %v305_v35 = vor.u32 %v304_v29, %v300_v28  ;;  %v409_v36 = vshrl.u32 %v3449_v13, 16  ;;  %v412_v37 = vshll.u32 %v3449_v13, 16 }
  0x25   : > { %v418_v38 = vshll.u32 %v3455_v18, 16  ;;  %v296_v41 = vrot.slane %v295_v33, 4  ;;  %v422_v42 = vshrl.u32 %v3455_v18, 16  ;;  %v428_v43 = vshll.u32 %v3473_v30, 16 }
  0x26   : > { %v3483_v40 = vpack.c.b16 %v706_v31, %v705_v27  ;;  %v306_v44 = vrot.slane %v305_v35, 4  ;;  %v411_v45 = vrot.slane %v409_v36, 4  ;;  %v414_v46 = vrot.slane %v412_v37, 5  ;;  %v3513_v31 = vld [vmem:[%s3379_s25 + $0xc] sm:$0xf] }
  0x27   : > { %v420_v47 = vrot.slane %v418_v38, 5  ;;  %v301_v49 = vsel %vm3411_vm2, %v296_v41, %v300_v28  ;;  %v424_v50 = vrot.slane %v422_v42, 4  ;;  %v430_v51 = vrot.slane %v428_v43, 5  ;;  %v3228_v37 = vld [vmem:[%s4568_s1 + $0x48] sm:$0xff] }
  0x28   : > { %4614 = vst [vmem:[#allocation3_spill] sm:$0xff] %v3483_v40  ;;  %2792 = vmatmul.msk.bf16.vlgmr.msra.gmra.mxu3 %vm753_vm3, %v3483_v40  ;;  %v505_v53 = vshrl.u32 %v3481_v39, 16  ;;  %v311_v54 = vsel %vm3411_vm2, %v306_v44, %v310_v34  ;;  %v681_v55 = vunpack.c.l.b16 %v301_v49  ;;  %v415_v56 = vor.u32 %v414_v46, %v411_v45  ;;  %v3523_v44 = vld [vmem:[%s3379_s25 + $0x10] sm:$0xf]  ;;  %v3526_v49 = vld [vmem:[%s3379_s25 + $0x14] sm:$0x1]  ;;  %1398 = vmatpush.bf16.msrb.mxu2 %v3228_v37 }
  0x29   : > { %v508_v57 = vshll.u32 %v3481_v39, 16  ;;  %v682_v58 = vunpack.c.l.b16 %v311_v54  ;;  %v425_v61 = vor.u32 %v424_v50, %v420_v47  ;;  %v514_v1 = vshll.u32 %v3488_v48, 16 }
  0x2a   : > { %v507_v62 = vrot.slane %v505_v53, 4  ;;  %v416_v2 = vrot.slane %v415_v56, 4  ;;  %v518_v7 = vshrl.u32 %v3488_v48, 16  ;;  %v524_v8 = vshll.u32 %v3495_v52, 16 }
  0x2b   : > { %v510_v6 = vrot.slane %v508_v57, 5  ;;  %v713_v10 = vpack.c.b16 %v682_v58, %v681_v55  ;;  %v426_v11 = vrot.slane %v425_v61, 4  ;;  %v516_v12 = vrot.slane %v514_v1, 5  ;;  %v3536_v61 = vld [vmem:[%s3379_s25 + $0x48] sm:$0xf] }
  0x2c   : > { %v421_v15 = vsel %vm3411_vm2, %v416_v2, %v420_v47  ;;  %v520_v17 = vrot.slane %v518_v7, 4  ;;  %v526_v20 = vrot.slane %v524_v8, 5  ;;  %v601_v24 = vshrl.u32 %v262_v9, 16  ;;  %v3232_v8 = vld [vmem:[%s4568_s1 + $0x68] sm:$0xff] }
  0x2d   : > { %v511_v16 = vor.u32 %v510_v6, %v507_v62  ;;  %2780 = vmatmul.msk.bf16.vlgmr.msra.gmra.mxu0 %vm753_vm3, %v713_v10  ;;  %v431_v22 = vsel %vm3411_vm2, %v426_v11, %v430_v51  ;;  %v691_v23 = vunpack.c.l.b16 %v421_v15  ;;  %v604_v25 = vshll.u32 %v262_v9, 16  ;;  %v3539_v62 = vld [vmem:[%s3379_s25 + $0x4c] sm:$0xf]  ;;  %1560 = vmatpush.bf16.msrb.mxu3 %v3232_v8 }
  0x2e   : > { %v692_v26 = vunpack.c.l.b16 %v431_v22  ;;  %v521_v28 = vor.u32 %v520_v17, %v516_v12  ;;  %v610_v29 = vshll.u32 %v263_v14, 16  ;;  %v603_v33 = vrot.slane %v601_v24, 4  ;;  %v3220_v9 = vld [vmem:[%s4568_s1 + $0x8] sm:$0xff]  ;;  %v3557_v22 = vld [vmem:[%s3379_s25 + $0x50] sm:$0x1] }
  0x2f   : > { %v512_v27 = vrot.slane %v511_v16, 4  ;;  %v606_v34 = vrot.slane %v604_v25, 5  ;;  %v614_v35 = vshrl.u32 %v263_v14, 16  ;;  %v620_v36 = vshll.u32 %v264_v21, 16  ;;  %v3236_v15 = vld [vmem:[%s4568_s1 + $0x88] sm:$0xff]  ;;  %1049 = vmatpush.bf16.msrb.mxu1 %v3220_v9 }
  0x30   : > { %v3518_v38 = vpack.c.b16 %v692_v26, %v691_v23  ;;  %v522_v42 = vrot.slane %v521_v28, 4  ;;  %v612_v43 = vrot.slane %v610_v29, 5  ;;  %v313_v53 = vshrl.u32 %v3513_v31, 16  ;;  %1744 = vmatpush.bf16.msrb.mxu0 %v3236_v15  ;;  %v3591_v15 = vld [vmem:[%s3379_s25 + $0xa8] sm:$0xf] }
  0x31   : > { %v517_v41 = vsel %vm3411_vm2, %v512_v27, %v516_v12  ;;  %v607_v46 = vor.u32 %v606_v34, %v603_v33  ;;  %v616_v47 = vrot.slane %v614_v35, 4  ;;  %v622_v51 = vrot.slane %v620_v36, 5  ;;  %v3568_v34 = vld [vmem:[%s3379_s25 + $0x78] sm:$0xf]  ;;  %4616 = vst [vmem:[#allocation5_spill] sm:$0xff] %v3591_v15 }
  0x32   : > { %v699_v45 = vunpack.c.l.b16 %v517_v41  ;;  %2785 = vmatmul.msk.bf16.gmra.mxu1 %vm753_vm3, %v3518_v38  ;;  %v527_v50 = vsel %vm3411_vm2, %v522_v42, %v526_v20  ;;  %v316_v54 = vshll.u32 %v3513_v31, 16  ;;  %v322_v58 = vshll.u32 %v3523_v44, 16  ;;  %v3572_v42 = vld [vmem:[%s3379_s25 + $0x7c] sm:$0xf] }
  0x33   : > { %v700_v55 = vunpack.c.l.b16 %v527_v50  ;;  %v608_v56 = vrot.slane %v607_v46, 4  ;;  %v617_v57 = vor.u32 %v616_v47, %v612_v43  ;;  %v315_v1 = vrot.slane %v313_v53, 4 }
  0x34   : > { %v318_v2 = vrot.slane %v316_v54, 5  ;;  %v326_v6 = vshrl.u32 %v3523_v44, 16  ;;  %v332_v7 = vshll.u32 %v3526_v49, 16  ;;  %v324_v14 = vrot.slane %v322_v58, 5  ;;  %v3579_v54 = vld [vmem:[%s3379_s25 + $0x80] sm:$0x1] }
  0x35   : > { %v3549_v10 = vpack.c.b16 %v700_v55, %v699_v45  ;;  %v613_v11 = vsel %vm3411_vm2, %v608_v56, %v612_v43  ;;  %v618_v12 = vrot.slane %v617_v57, 4  ;;  %v433_v24 = vshrl.u32 %v3536_v61, 16 }
  0x36   : > { %v707_v16 = vunpack.c.l.b16 %v613_v11  ;;  %v319_v17 = vor.u32 %v318_v2, %v315_v1  ;;  %v328_v20 = vrot.slane %v326_v6, 4  ;;  %v334_v21 = vrot.slane %v332_v7, 5 }
  0x37   : > { %2789 = vmatmul.msk.bf16.gmra.mxu2 %vm753_vm3, %v3549_v10  ;;  %v623_v23 = vsel %vm3411_vm2, %v618_v12, %v622_v51  ;;  %v436_v25 = vshll.u32 %v3536_v61, 16  ;;  %v442_v26 = vshll.u32 %v3539_v62, 16  ;;  %v446_v33 = vshrl.u32 %v3539_v62, 16 }
  0x38   : > { %v708_v27 = vunpack.c.l.b16 %v623_v23  ;;  %v320_v28 = vrot.slane %v319_v17, 4  ;;  %v329_v29 = vor.u32 %v328_v20, %v324_v14  ;;  %v435_v35 = vrot.slane %v433_v24, 4  ;;  %v3601_v23 = vld [vmem:[%s3379_s25 + $0xb0] sm:$0x1] }
  0x39   : > { %v438_v36 = vrot.slane %v436_v25, 5  ;;  %v444_v37 = vrot.slane %v442_v26, 5  ;;  %v452_v41 = vshll.u32 %v3557_v22, 16  ;;  %v448_v47 = vrot.slane %v446_v33, 4  ;;  %4618 = vst [vmem:[#allocation7_spill] sm:$0xff] %v3601_v23 }
  0x3a   : > { %v3574_v43 = vpack.c.b16 %v708_v27, %v707_v16  ;;  %v325_v45 = vsel %vm3411_vm2, %v320_v28, %v324_v14  ;;  %v330_v46 = vrot.slane %v329_v29, 4  ;;  %v529_v55 = vshrl.u32 %v3568_v34, 16 }
  0x3b   : > { %v683_v50 = vunpack.c.l.b16 %v325_v45  ;;  %v439_v51 = vor.u32 %v438_v36, %v435_v35  ;;  %v454_v53 = vrot.slane %v452_v41, 5  ;;  %v449_v57 = vor.u32 %v448_v47, %v444_v37 }
  0x3c   : > { %4615 = vst [vmem:[#allocation4_spill] sm:$0xff] %v3574_v43  ;;  %2793 = vmatmul.msk.bf16.gmra.mxu3 %vm753_vm3, %v3574_v43  ;;  %v335_v56 = vsel %vm3411_vm2, %v330_v46, %v334_v21  ;;  %v532_v58 = vshll.u32 %v3568_v34, 16  ;;  %v538_v1 = vshll.u32 %v3572_v42, 16  ;;  %v531_v7 = vrot.slane %v529_v55, 4  ;;  %v3598_v21 = vld [vmem:[%s3379_s25 + $0xac] sm:$0xf] }
  0x3d   : > { %v684_v2 = vunpack.c.l.b16 %v335_v56  ;;  %v440_v6 = vrot.slane %v439_v51, 4  ;;  %v542_v8 = vshrl.u32 %v3572_v42, 16  ;;  %v450_v9 = vrot.slane %v449_v57, 4  ;;  %4617 = vst [vmem:[#allocation6_spill] sm:$0xff] %v3598_v21  ;;  %v3227_v55 = vld [vmem:[%s4568_s1 + $0x40] sm:$0xff] }
  0x3e   : > { %v534_v11 = vrot.slane %v532_v58, 5  ;;  %v540_v12 = vrot.slane %v538_v1, 5  ;;  %v548_v14 = vshll.u32 %v3579_v54, 16  ;;  %v625_v33 = vshrl.u32 %v3591_v15, 16  ;;  %v3623_v1 = vld [vmem:[%s3379_s25 + $0x1c] sm:$0xf]  ;;  %1399 = vmatpush.bf16.msrb.mxu2 %v3227_v55 }
  0x3f   : > { %v3593_v16 = vpack.c.b16 %v684_v2, %v683_v50  ;;  %v445_v17 = vsel %vm3411_vm2, %v440_v6, %v444_v37  ;;  %v544_v20 = vrot.slane %v542_v8, 4  ;;  %v455_v24 = vsel %vm3411_vm2, %v450_v9, %v454_v53  ;;  %v3615_v53 = vld [vmem:[%s3379_s25 + $0x18] sm:$0xf]  ;;  %v3626_v2 = vld [vmem:[%s3379_s25 + $0x20] sm:$0x1] }
  0x40   : > { %v693_v25 = vunpack.c.l.b16 %v445_v17  ;;  %v535_v26 = vor.u32 %v534_v11, %v531_v7  ;;  %v550_v27 = vrot.slane %v548_v14, 5  ;;  %v694_v28 = vunpack.c.l.b16 %v455_v24 }
  0x41   : > { %2781 = vmatmul.msk.bf16.gmra.mxu0 %vm753_vm3, %v3593_v16  ;;  %v545_v29 = vor.u32 %v544_v20, %v540_v12  ;;  %v628_v35 = vshll.u32 %v3591_v15, 16  ;;  %v634_v37 = vshll.u32 %v3598_v21, 16  ;;  %v638_v41 = vshrl.u32 %v3598_v21, 16  ;;  %v3635_v20 = vld [vmem:[%s3379_s25 + $0x54] sm:$0xf] }
  0x42   : > { %v536_v36 = vrot.slane %v535_v26, 4  ;;  %v644_v45 = vshll.u32 %v3601_v23, 16  ;;  %v3612_v46 = vpack.c.b16 %v694_v28, %v693_v25  ;;  %v627_v50 = vrot.slane %v625_v33, 4  ;;  %v3641_v28 = vld [vmem:[%s3379_s25 + $0x58] sm:$0xf] }
  0x43   : > { %v546_v47 = vrot.slane %v545_v29, 4  ;;  %v630_v51 = vrot.slane %v628_v35, 5  ;;  %v636_v57 = vrot.slane %v634_v37, 5  ;;  %v640_v58 = vrot.slane %v638_v41, 4  ;;  %v3231_v37 = vld [vmem:[%s4568_s1 + $0x60] sm:$0xff] }
  0x44   : > { %4619 = vst [vmem:[#allocation8_spill] sm:$0xff] %v3612_v46  ;;  %v541_v56 = vsel %vm3411_vm2, %v536_v36, %v540_v12  ;;  %2786 = vmatmul.msk.bf16.gmra.mxu1 %vm753_vm3, %v3612_v46  ;;  %v646_v9 = vrot.slane %v644_v45, 5  ;;  %v337_v12 = vshrl.u32 %v3615_v53, 16  ;;  %v340_v17 = vshll.u32 %v3615_v53, 16  ;;  %v3219_v41 = vld [vmem:[%s4568_s1] sm:$0xff]  ;;  %1561 = vmatpush.bf16.msrb.mxu3 %v3231_v37 }
  0x45   : > { %v551_v6 = vsel %vm3411_vm2, %v546_v47, %v550_v27  ;;  %v701_v7 = vunpack.c.l.b16 %v541_v56  ;;  %v631_v8 = vor.u32 %v630_v51, %v627_v50  ;;  %v641_v14 = vor.u32 %v640_v58, %v636_v57  ;;  %v3235_v45 = vld [vmem:[%s4568_s1 + $0x80] sm:$0xff]  ;;  %v3657_v56 = vld [vmem:[%s3379_s25 + $0x5c] sm:$0x1]  ;;  %1050 = vmatpush.bf16.msrb.mxu1 %v3219_v41  ;;  %v3674_v37 = vld [vmem:[%s3379_s25 + $0x88] sm:$0xf] }
  0x46   : > { %v702_v11 = vunpack.c.l.b16 %v551_v6  ;;  %v346_v25 = vshll.u32 %v3623_v1, 16  ;;  %v350_v26 = vshrl.u32 %v3623_v1, 16  ;;  %v356_v27 = vshll.u32 %v3626_v2, 16  ;;  %1745 = vmatpush.bf16.msrb.mxu0 %v3235_v45  ;;  %4622 = vst [vmem:[#allocation11_spill] sm:$0xff] %v3674_v37  ;;  %v3679_v41 = vld [vmem:[%s3379_s25 + $0x8c] sm:$0x1] }
  0x47   : > { %v632_v24 = vrot.slane %v631_v8, 4  ;;  %v642_v33 = vrot.slane %v641_v14, 4  ;;  %v339_v35 = vrot.slane %v337_v12, 4  ;;  %v342_v36 = vrot.slane %v340_v17, 5  ;;  %v3667_v17 = vld [vmem:[%s3379_s25 + $0x84] sm:$0xf] }
  0x48   : > { %v3643_v29 = vpack.c.b16 %v702_v11, %v701_v7  ;;  %v348_v50 = vrot.slane %v346_v25, 5  ;;  %v352_v51 = vrot.slane %v350_v26, 4  ;;  %v358_v55 = vrot.slane %v356_v27, 5  ;;  %4620 = vst [vmem:[#allocation9_spill] sm:$0xff] %v3667_v17  ;;  %v3691_v15 = vld [vmem:[%s3379_s25 + $0xb4] sm:$0xf] }
  0x49   : > { %v637_v47 = vsel %vm3411_vm2, %v632_v24, %v636_v57  ;;  %v647_v58 = vsel %vm3411_vm2, %v642_v33, %v646_v9  ;;  %v343_v7 = vor.u32 %v342_v36, %v339_v35  ;;  %v457_v8 = vshrl.u32 %v3635_v20, 16  ;;  %4623 = vst [vmem:[#allocation12_spill] sm:$0xff] %v3679_v41 }
  0x4a   : > { %2790 = vmatmul.msk.bf16.gmra.mxu2 %vm753_vm3, %v3643_v29  ;;  %v709_v6 = vunpack.c.l.b16 %v637_v47  ;;  %v710_v11 = vunpack.c.l.b16 %v647_v58  ;;  %v353_v14 = vor.u32 %v352_v51, %v348_v50  ;;  %v460_v57 = vshll.u32 %v3635_v20, 16  ;;  %4624 = vst [vmem:[#allocation13_spill] sm:$0xff] %v3691_v15 }
  0x4b   : > { %v466_v12 = vshll.u32 %v3641_v28, 16  ;;  %v344_v24 = vrot.slane %v343_v7, 4  ;;  %v459_v25 = vrot.slane %v457_v8, 4  ;;  %v470_v9 = vshrl.u32 %v3641_v28, 16 }
  0x4c   : > { %v476_v26 = vshll.u32 %v3657_v56, 16  ;;  %v3671_v27 = vpack.c.b16 %v710_v11, %v709_v6  ;;  %v354_v33 = vrot.slane %v353_v14, 4  ;;  %v462_v35 = vrot.slane %v460_v57, 5 }
  0x4d   : > { %v468_v36 = vrot.slane %v466_v12, 5  ;;  %v349_v47 = vsel %vm3411_vm2, %v344_v24, %v348_v50  ;;  %v472_v51 = vrot.slane %v470_v9, 4  ;;  %v553_v45 = vshrl.u32 %v3667_v17, 16 }
  0x4e   : > { %4621 = vst [vmem:[#allocation10_spill] sm:$0xff] %v3671_v27  ;;  %v478_v58 = vrot.slane %v476_v26, 5  ;;  %2794 = vmatmul.msk.bf16.gmra.mxu3 %vm753_vm3, %v3671_v27  ;;  %v359_v6 = vsel %vm3411_vm2, %v354_v33, %v358_v55  ;;  %v685_v7 = vunpack.c.l.b16 %v349_v47  ;;  %v463_v8 = vor.u32 %v462_v35, %v459_v25  ;;  %v3696_v35 = vld [vmem:[%s3379_s25 + $0xb8] sm:$0xf] }
  0x4f   : > { %v556_v11 = vshll.u32 %v3667_v17, 16  ;;  %v686_v14 = vunpack.c.l.b16 %v359_v6  ;;  %v473_v50 = vor.u32 %v472_v51, %v468_v36  ;;  %v555_v57 = vrot.slane %v553_v45, 4  ;;  %4625 = vst [vmem:[#allocation14_spill] sm:$0xff] %v3696_v35 }
  0x50   : > { %v562_v12 = vshll.u32 %v3674_v37, 16  ;;  %v464_v24 = vrot.slane %v463_v8, 4  ;;  %v566_v26 = vshrl.u32 %v3674_v37, 16  ;;  %v572_v27 = vshll.u32 %v3679_v41, 16  ;;  %v3701_v8 = vld [vmem:[%s3379_s25 + $0xbc] sm:$0x1] }
  0x51   : > { %v558_v9 = vrot.slane %v556_v11, 5  ;;  %v3693_v55 = vpack.c.b16 %v686_v14, %v685_v7  ;;  %v474_v33 = vrot.slane %v473_v50, 4  ;;  %4626 = vst [vmem:[#allocation15_spill] sm:$0xff] %v3701_v8  ;;  %v3246_v11 = vld [vmem:[%s4568_s1 + $0xd8] sm:$0xff]  ;;  %v649_v50 = vshrl.u32 %v3691_v15, 16 }
  0x52   : > { %v564_v25 = vrot.slane %v562_v12, 5  ;;  %v469_v47 = vsel %vm3411_vm2, %v464_v24, %v468_v36  ;;  %v568_v45 = vrot.slane %v566_v26, 4  ;;  %v574_v6 = vrot.slane %v572_v27, 5  ;;  %2072 = vmatpush.bf16.msra.mxu2 %v3246_v11 }
  0x53   : > { %v559_v51 = vor.u32 %v558_v9, %v555_v57  ;;  %2782 = vmatmul.msk.bf16.gmra.mxu0 %vm753_vm3, %v3693_v55  ;;  %v479_v7 = vsel %vm3411_vm2, %v474_v33, %v478_v58  ;;  %v695_v14 = vunpack.c.l.b16 %v469_v47  ;;  %v652_v36 = vshll.u32 %v3691_v15, 16  ;;  %v3716_v58 = vld [vmem:[%s3379_s25 + $0x24] sm:$0xf] }
  0x54   : > { %v696_v27 = vunpack.c.l.b16 %v479_v7  ;;  %v569_v12 = vor.u32 %v568_v45, %v564_v25  ;;  %v658_v24 = vshll.u32 %v3696_v35, 16  ;;  %v651_v9 = vrot.slane %v649_v50, 4  ;;  %v3726_v45 = vld [vmem:[%s3379_s25 + $0x2c] sm:$0x1] }
  0x55   : > { %v560_v57 = vrot.slane %v559_v51, 4  ;;  %v654_v26 = vrot.slane %v652_v36, 5  ;;  %v662_v23 = vshrl.u32 %v3696_v35, 16  ;;  %v668_v21 = vshll.u32 %v3701_v8, 16  ;;  %v3723_v51 = vld [vmem:[%s3379_s25 + $0x28] sm:$0xf] }
  0x56   : > { %v3718_v33 = vpack.c.b16 %v696_v27, %v695_v14  ;;  %v570_v15 = vrot.slane %v569_v12, 4  ;;  %v660_v7 = vrot.slane %v658_v24, 5  ;;  %v3250_v8 = vld [vmem:[%s4568_s1 + $0xf8] sm:$0xff]  ;;  %v364_v12 = vshll.u32 %v3716_v58, 16 }
  0x57   : > { %v565_v47 = vsel %vm3411_vm2, %v560_v57, %v564_v25  ;;  %v655_v50 = vor.u32 %v654_v26, %v651_v9  ;;  %v664_v36 = vrot.slane %v662_v23, 4  ;;  %v3242_v14 = vld [vmem:[%s4568_s1 + $0xb8] sm:$0xff]  ;;  %v670_v57 = vrot.slane %v668_v21, 5  ;;  %2256 = vmatpush.bf16.msra.mxu3 %v3250_v8 }
  0x58   : > { %4627 = vst [vmem:[#allocation16_spill] sm:$0xff] %v3718_v33  ;;  %v703_v11 = vunpack.c.l.b16 %v565_v47  ;;  %v3254_v25 = vld [vmem:[%s4568_s1 + $0x118] sm:$0xff]  ;;  %2787 = vmatmul.msk.bf16.gmra.mxu1 %vm753_vm3, %v3718_v33  ;;  %v575_v27 = vsel %vm3411_vm2, %v570_v15, %v574_v6  ;;  %v361_v23 = vshrl.u32 %v3716_v58, 16  ;;  %v370_v47 = vshll.u32 %v3723_v51, 16 }
  0x59   : > { %v704_v24 = vunpack.c.l.b16 %v575_v27  ;;  %v656_v9 = vrot.slane %v655_v50, 4  ;;  %v665_v26 = vor.u32 %v664_v36, %v660_v7  ;;  %1910 = vmatpush.bf16.msra.mxu1 %v3242_v14  ;;  %v366_v43 = vrot.slane %v364_v12, 5  ;;  %2424 = vmatpush.bf16.msra.mxu0 %v3254_v25 }
  0x5a   : > { %v363_v35 = vrot.slane %v361_v23, 4  ;;  %v374_v40 = vshrl.u32 %v3723_v51, 16  ;;  %v380_v17 = vshll.u32 %v3726_v45, 16  ;;  %v372_v27 = vrot.slane %v370_v47, 5 }
  0x5b   : > { %v3746_v15 = vpack.c.b16 %v704_v24, %v703_v11  ;;  %v661_v21 = vsel %vm3411_vm2, %v656_v9, %v660_v7  ;;  %v666_v6 = vrot.slane %v665_v26, 4  ;;  %v2892_v11 = vrot.slane %v3427_v59, 9 }
  0x5c   : > { %v711_v50 = vunpack.c.l.b16 %v661_v21  ;;  %v367_v36 = vor.u32 %v366_v43, %v363_v35  ;;  %v376_v41 = vrot.slane %v374_v40, 4  ;;  %v382_v37 = vrot.slane %v380_v17, 5 }
  0x5d   : > { %4628 = vst [vmem:[#allocation17_spill] sm:$0xff] %v3746_v15  ;;  %2791 = vmatmul.msk.bf16.gmra.mxu2 %vm753_vm3, %v3746_v15  ;;  %v671_v8 = vsel %vm3411_vm2, %v666_v6, %v670_v57  ;;  %v1153_v40 = vrot.slane %v3434_v63, 5  ;;  %v1156_v43 = vrot.slane %v3437_v0, 5  ;;  %v2893_v17 = vrot.slane %v3513_v31, 9  ;;  %v3201_v6 = vld [vmem:[%s3379_s25] sm:$0xff] }
  0x5e   : > { %v712_v14 = vunpack.c.l.b16 %v671_v8  ;;  %v368_v25 = vrot.slane %v367_v36, 4  ;;  %v377_v23 = vor.u32 %v376_v41, %v372_v27  ;;  %v1160_v35 = vrot.slane %v3523_v44, 5 }
  0x5f   : > { %v1163_v57 = vrot.slane %v3526_v49, 5  ;;  %v1154_v24 = vsel %vm3755_vm6, %v2892_v11, %v1153_v40  ;;  %v1155_v63 = vrot.slane %v1153_v40, 4  ;;  %v2894_v40 = vrot.slane %v3615_v53, 9 }
  0x60   : > { %v3764_v12 = vpack.c.b16 %v712_v14, %v711_v50  ;;  %v373_v59 = vsel %vm3411_vm2, %v368_v25, %v372_v27  ;;  %v378_v41 = vrot.slane %v377_v23, 4  ;;  %v1161_v0 = vsel %vm3755_vm6, %v2893_v17, %v1160_v35  ;;  %v3202_v14 = vld [vmem:[%s3379_s25 + $0xc] sm:$0xff]  ;;  %v3798_v23 = vld [vmem:[%s3379_s25 + $0x18] sm:$0xff] }
  0x61   : > { %v687_v9 = vunpack.c.l.b16 %v373_v59  ;;  %v1272_v44 = vunpack.c.l.b16 %v1154_v24  ;;  %v1162_v49 = vrot.slane %v1160_v35, 4  ;;  %v1157_v47 = vsel %vm3755_vm6, %v1155_v63, %v1156_v43  ;;  %v3818_v59 = vld [vmem:[%s3379_s25 + $0x24] sm:$0xff] }
  0x62   : > { %2795 = vmatmul.msk.bf16.gmra.mxu3 %vm753_vm3, %v3764_v12  ;;  %v383_v31 = vsel %vm3411_vm2, %v378_v41, %v382_v37  ;;  %v1274_v21 = vunpack.c.l.b16 %v1161_v0  ;;  %v1273_v27 = vunpack.c.l.b16 %v1157_v47  ;;  %v1167_v25 = vrot.slane %v3623_v1, 5 }
  0x63   : > { %v688_v26 = vunpack.c.l.b16 %v383_v31  ;;  %v1164_v50 = vsel %vm3755_vm6, %v1162_v49, %v1163_v57  ;;  %v1170_v17 = vrot.slane %v3626_v2, 5  ;;  %v1174_v2 = vrot.slane %v3723_v51, 5  ;;  %v3245_v51 = vld [vmem:[%s4568_s1 + $0xd0] sm:$0xff] }
  0x64   : > { %v1275_v8 = vunpack.c.l.b16 %v1164_v50  ;;  %v1304_v11 = vpack.c.b16 %v1273_v27, %v1272_v44  ;;  %v1169_v43 = vrot.slane %v1167_v25, 4  ;;  %v2895_v41 = vrot.slane %v3716_v58, 9  ;;  %2073 = vmatpush.bf16.msra.mxu2 %v3245_v51  ;;  %v3241_v44 = vld [vmem:[%s4568_s1 + $0xb0] sm:$0xff] }
  0x65   : > { %v3781_v36 = vpack.c.b16 %v688_v26, %v687_v9  ;;  %v1176_v24 = vrot.slane %v1174_v2, 4  ;;  %v1177_v9 = vrot.slane %v3726_v45, 5  ;;  %v3249_v45 = vld [vmem:[%s4568_s1 + $0xf0] sm:$0xff]  ;;  %1911 = vmatpush.bf16.msra.mxu1 %v3241_v44  ;;  %v1181_v47 = vrot.slane %v3385_v4, 5 }
  0x66   : > { %v3785_v37 = vpack.c.b16 %v1275_v8, %v1274_v21  ;;  %v1171_v1 = vsel %vm3755_vm6, %v1169_v43, %v1170_v17  ;;  %v1175_v63 = vsel %vm3755_vm6, %v2895_v41, %v1174_v2  ;;  %v3253_v49 = vld [vmem:[%s4568_s1 + $0x110] sm:$0xff]  ;;  %2257 = vmatpush.bf16.msra.mxu3 %v3249_v45  ;;  %v2896_v27 = vrot.slane %v3382_v3, 9 }
  0x67   : > { %2783 = vmatmul.msk.bf16.gmra.mxu0 %vm753_vm3, %v3781_v36  ;;  %v1277_v57 = vunpack.c.l.b16 %v1171_v1  ;;  %v1178_v0 = vsel %vm3755_vm6, %v1176_v24, %v1177_v9  ;;  %v1278_v31 = vunpack.c.l.b16 %v1175_v63  ;;  %v1183_v50 = vrot.slane %v1181_v47, 4  ;;  %v3880_v1 = vld [vmem:[%s3379_s25 + $0x3c] sm:$0xff] }
  0x68   : > { %2876 = vmatmul.msk.bf16.vlgmr.msrb.gmra.mxu1 %vm753_vm3, %v3201_v6  ;;  %v1279_v58 = vunpack.c.l.b16 %v1178_v0  ;;  %2425 = vmatpush.bf16.msra.mxu0 %v3253_v49  ;;  %v3852_v6 = vld [vmem:[%s3379_s25 + $0x30] sm:$0xff]  ;;  %v1184_v8 = vrot.slane %v3388_v5, 5  ;;  %v1182_v4 = vsel %vm3755_vm6, %v2896_v27, %v1181_v47  ;;  %v1191_v41 = vrot.slane %v3473_v30, 5  ;;  %v3914_v49 = vld [vmem:[%s3379_s25 + $0x48] sm:$0xff] }
  0x69   : > { %v1195_v45 = vrot.slane %v3539_v62, 5  ;;  %v2898_v27 = vrot.slane %v3536_v61, 9 }
  0x6a   : > { %v3844_v26 = vpack.c.b16 %v1279_v58, %v1278_v31 }
  0x6d   : > { %2932 = vmatmul.msk.bf16.vlgmr.msrb.gmra.mxu2 %vm753_vm3, %v1304_v11  ;;  %v1185_v11 = vsel %vm3755_vm6, %v1183_v50, %v1184_v8  ;;  %v1197_v50 = vrot.slane %v1195_v45, 4  ;;  %v1198_v8 = vrot.slane %v3557_v22, 5 }
  0x72   : > { %2976 = vmatmul.msk.bf16.vlgmr.msrb.gmra.mxu3 %vm753_vm3, %v3202_v14 }
  0x77   : > { %3016 = vmatmul.msk.bf16.vlgmr.msrb.gmra.mxu0 %vm753_vm3, %v3593_v16  ;;  %v1168_v16 = vsel %vm3755_vm6, %v2894_v40, %v1167_v25  ;;  %v1280_v25 = vunpack.c.l.b16 %v1182_v4  ;;  %v1281_v40 = vunpack.c.l.b16 %v1185_v11  ;;  %v1196_v11 = vsel %vm3755_vm6, %v2898_v27, %v1195_v45 }
  0x78   : > { %2877 = vmatmul.msk.bf16.gmra.mxu1 %vm753_vm3, %v3202_v14  ;;  %v1276_v35 = vunpack.c.l.b16 %v1168_v16  ;;  %v1188_v16 = vrot.slane %v3455_v18, 5  ;;  %v1205_v45 = vrot.slane %v3657_v56, 5 }
  0x79   : > { %v3872_v5 = vpack.c.b16 %v1281_v40, %v1280_v25  ;;  %v1199_v25 = vsel %vm3755_vm6, %v1197_v50, %v1198_v8  ;;  %v1284_v40 = vunpack.c.l.b16 %v1196_v11 }
  0x7a   : > { %v3812_v53 = vpack.c.b16 %v1277_v57, %v1276_v35  ;;  %v2897_v57 = vrot.slane %v3449_v13, 9  ;;  %v1190_v2 = vrot.slane %v1188_v16, 4 }
  0x7c   : > { %v1189_v18 = vsel %vm3755_vm6, %v2897_v57, %v1188_v16  ;;  %v1192_v9 = vsel %vm3755_vm6, %v1190_v2, %v1191_v41  ;;  %v1285_v16 = vunpack.c.l.b16 %v1199_v25  ;;  %v1202_v2 = vrot.slane %v3641_v28, 5 }
  0x7d   : > { %2933 = vmatmul.msk.bf16.gmra.mxu2 %vm753_vm3, %v3785_v37  ;;  %v1282_v13 = vunpack.c.l.b16 %v1189_v18  ;;  %v1283_v51 = vunpack.c.l.b16 %v1192_v9  ;;  %v3948_v9 = vld [vmem:[%s3379_s25 + $0x54] sm:$0xff] }
  0x7e   : > { %v3938_v57 = vpack.c.b16 %v1285_v16, %v1284_v40  ;;  %4636 = vst [vmem:[#allocation23_spill] sm:$0xff] %v3948_v9  ;;  %v3248_v16 = vld [vmem:[%s4568_s1 + $0xe8] sm:$0xff] }
  0x7f   : > { %v3904_v31 = vpack.c.b16 %v1283_v51, %v1282_v13  ;;  %v2899_v13 = vrot.slane %v3635_v20, 9  ;;  %v1204_v51 = vrot.slane %v1202_v2, 4  ;;  %v3244_v20 = vld [vmem:[%s4568_s1 + $0xc8] sm:$0xff]  ;;  %2258 = vmatpush.bf16.msra.mxu3 %v3248_v16  ;;  %v3295_v16 = vld [vmem:[%s3379_s25 + $0x60] sm:$0xf] }
  0x80   : > { %4635 = vst [vmem:[#allocation22_spill] sm:$0xff] %v3938_v57  ;;  %2074 = vmatpush.bf16.msra.mxu2 %v3244_v20  ;;  %v3252_v20 = vld [vmem:[%s4568_s1 + $0x108] sm:$0xff] }
  0x81   : > { %v1203_v28 = vsel %vm3755_vm6, %v2899_v13, %v1202_v2  ;;  %v1206_v8 = vsel %vm3755_vm6, %v1204_v51, %v1205_v45  ;;  %v3240_v2 = vld [vmem:[%s4568_s1 + $0xa8] sm:$0xff]  ;;  %v3293_v45 = vld [vmem:[%s3379_s25 + $0x64] sm:$0xf]  ;;  %2426 = vmatpush.bf16.msra.mxu0 %v3252_v20 }
  0x82   : > { %2977 = vmatmul.msk.bf16.gmra.mxu3 %vm753_vm3, %v3798_v23  ;;  %v1286_v56 = vunpack.c.l.b16 %v1203_v28  ;;  %v1287_v25 = vunpack.c.l.b16 %v1206_v8  ;;  %1912 = vmatpush.bf16.msra.mxu1 %v3240_v2  ;;  %v1209_v28 = vrot.slane %v3293_v45, 5  ;;  %v2900_v2 = vrot.slane %v3295_v16, 9 }
  0x84   : > { %v3979_v13 = vpack.c.b16 %v1287_v25, %v1286_v56  ;;  %v3995_v25 = vld [vmem:[%s3379_s25 + $0x60] sm:$0xff] }
  0x85   : > { %4640 = vst [vmem:[#allocation27_spill] sm:$0xff] %v3995_v25 }
  0x86   : > { %4638 = vst [vmem:[#allocation25_spill] sm:$0xff] %v3979_v13 }
  0x87   : > { %3017 = vmatmul.msk.bf16.gmra.mxu0 %vm753_vm3, %v3693_v55 }
  0x88   : > { %2878 = vmatmul.msk.bf16.gmra.mxu1 %vm753_vm3, %v3798_v23 }
  0x8d   : > { %2934 = vmatmul.msk.bf16.gmra.mxu2 %vm753_vm3, %v3812_v53 }
  0x92   : > { %2978 = vmatmul.msk.bf16.gmra.mxu3 %vm753_vm3, %v3818_v59 }
  0x97   : > { %3018 = vmatmul.msk.bf16.gmra.mxu0 %vm753_vm3, %v3781_v36 }
  0x98   : > { %2879 = vmatmul.msk.bf16.gmra.mxu1 %vm753_vm3, %v3818_v59 }
  0x9d   : > { %v3847_v21 = vpop.f32.mrf.mxu1  ;;  %2935 = vmatmul.msk.bf16.gmra.mxu2 %vm753_vm3, %v3844_v26 }
  0xa2   : > { %2979 = vmatmul.msk.bf16.gmra.mxu3 %vm753_vm3, %v3852_v6 }
  0xa5   : > { %v3862_v14 = vpop.f32.mrf.mxu1 }
  0xa7   : > { %v3864_v43 = vpop.f32.mrf.mxu2  ;;  %3019 = vmatmul.msk.bf16.gmra.mxu0 %vm753_vm3, %v3429_v60 }
  0xa8   : > { %2880 = vmatmul.msk.bf16.gmra.mxu1 %vm753_vm3, %v3852_v6 }
  0xaa   : > { %v3870_v3 = vpop.f32.mrf.mxu0 }
  0xab   : > { %v3874_v17 = vpop.f32.mrf.mxu3 }
  0xac   : > { %4631 = vst [vmem:[#allocation18_spill] sm:$0xff] %v3874_v17 }
  0xad   : > { %2936 = vmatmul.msk.bf16.gmra.mxu2 %vm753_vm3, %v3872_v5 }
  0xaf   : > { %v3882_v35 = vpop.f32.mrf.mxu1  ;;  %v3886_v24 = vpop.f32.mrf.mxu2 }
  0xb2   : > { %2980 = vmatmul.msk.bf16.gmra.mxu3 %vm753_vm3, %v3880_v1  ;;  %v3894_v63 = vpop.f32.mrf.mxu0 }
  0xb3   : > { %v3896_v0 = vpop.f32.mrf.mxu3 }
  0xb4   : > { %4632 = vst [vmem:[#allocation19_spill] sm:$0xff] %v3896_v0 }
  0xb7   : > { %3020 = vmatmul.msk.bf16.gmra.mxu0 %vm753_vm3, %v3518_v38  ;;  %v3900_v30 = vpop.f32.mrf.mxu1 }
  0xb8   : > { %2881 = vmatmul.msk.bf16.gmra.mxu1 %vm753_vm3, %v3880_v1 }
  0xba   : > { %v3906_v58 = vpop.f32.mrf.mxu2 }
  0xbd   : > { %2937 = vmatmul.msk.bf16.gmra.mxu2 %vm753_vm3, %v3904_v31 }
  0xbe   : > { %v3909_v44 = vpop.f32.mrf.mxu0 }
  0xbf   : > { %v3916_v47 = vpop.f32.mrf.mxu3 }
  0xc0   : > { %4633 = vst [vmem:[#allocation20_spill] sm:$0xff] %v3916_v47 }
  0xc1   : > { %v3920_v4 = vpop.f32.mrf.mxu1 }
  0xc2   : > { %2981 = vmatmul.msk.bf16.gmra.mxu3 %vm753_vm3, %v3914_v49  ;;  %v3924_v62 = vpop.f32.mrf.mxu2 }
  0xc6   : > { %v3930_v61 = vpop.f32.mrf.mxu0 }
  0xc7   : > { %3021 = vmatmul.msk.bf16.gmra.mxu0 %vm753_vm3, %v3612_v46  ;;  %v3934_v22 = vpop.f32.mrf.mxu3 }
  0xc8   : > { %4634 = vst [vmem:[#allocation21_spill] sm:$0xff] %v3934_v22  ;;  %2882 = vmatmul.msk.bf16.gmra.mxu1 %vm753_vm3, %v3914_v49  ;;  %v3294_v22 = vld [vmem:[%s3379_s25 + $0x68] sm:$0x1] }
  0xc9   : > { %v3941_v41 = vpop.f32.mrf.mxu1  ;;  %v1212_v56 = vrot.slane %v3294_v22, 5 }
  0xcd   : > { %v3943_v18 = vpop.f32.mrf.mxu2  ;;  %2938 = vmatmul.msk.bf16.gmra.mxu2 %vm753_vm3, %v3938_v57 }
  0xd0   : > { %v3952_v27 = vpop.f32.mrf.mxu0 }
  0xd1   : > { %v3954_v50 = vpop.f32.mrf.mxu3 }
  0xd2   : > { %4637 = vst [vmem:[#allocation24_spill] sm:$0xff] %v3954_v50  ;;  %2982 = vmatmul.msk.bf16.gmra.mxu3 %vm753_vm3, %v3948_v9 }
  0xd5   : > { %v3965_v11 = vpop.f32.mrf.mxu1  ;;  %v3967_v40 = vpop.f32.mrf.mxu2 }
  0xd7   : > { %3022 = vmatmul.msk.bf16.gmra.mxu0 %vm753_vm3, %v3718_v33  ;;  %v1211_v33 = vrot.slane %v1209_v28, 4 }
  0xd8   : > { %2883 = vmatmul.msk.bf16.gmra.mxu1 %vm753_vm3, %v3948_v9  ;;  %v3981_v51 = vpop.f32.mrf.mxu0 }
  0xd9   : > { %v3984_v8 = vpop.f32.mrf.mxu3 }
  0xda   : > { %4639 = vst [vmem:[#allocation26_spill] sm:$0xff] %v3984_v8  ;;  %v1210_v8 = vsel %vm3755_vm6, %v2900_v2, %v1209_v28 }
  0xdb   : > { %v1288_v16 = vunpack.c.l.b16 %v1210_v8 }
  0xdd   : > { %2939 = vmatmul.msk.bf16.gmra.mxu2 %vm753_vm3, %v3979_v13  ;;  %v3991_v50 = vpop.f32.mrf.mxu1  ;;  %v1213_v13 = vsel %vm3755_vm6, %v1211_v33, %v1212_v56  ;;  %v1216_v33 = vrot.slane %v3488_v48, 5 }
  0xde   : > { %v1289_v0 = vunpack.c.l.b16 %v1213_v13  ;;  %v4028_v13 = vld [vmem:[%s3379_s25 + $0x6c] sm:$0xff] }
  0xe0   : > { %v3998_v45 = vpop.f32.mrf.mxu2  ;;  %v4017_v28 = vpack.c.b16 %v1289_v0, %v1288_v16  ;;  %v1218_v0 = vrot.slane %v1216_v33, 4 }
  0xe2   : > { %2983 = vmatmul.msk.bf16.gmra.mxu3 %vm753_vm3, %v3995_v25  ;;  %4642 = vst [vmem:[#allocation29_spill] sm:$0xff] %v4017_v28 }
  0xe4   : > { %v4006_v47 = vpop.f32.mrf.mxu0 }
  0xe5   : > { %v4008_v22 = vpop.f32.mrf.mxu3  ;;  %v1052_v9 = vpop.f32.mrf.mxu1 }
  0xe6   : > { %4641 = vst [vmem:[#allocation28_spill] sm:$0xff] %v4008_v22  ;;  %v1053_v20 = vadd.f32 %v1052_v9, %v3870_v3  ;;  %v1219_v9 = vrot.slane %v3495_v52, 5  ;;  %v2901_v22 = vrot.slane %v3481_v39, 9 }
  0xe7   : > { %3023 = vmatmul.msk.bf16.gmra.mxu0 %vm753_vm3, %v3457_v19 }
  0xe8   : > { %v4013_v57 = vpop.f32.mrf.mxu2  ;;  %2884 = vmatmul.msk.bf16.gmra.mxu1 %vm753_vm3, %v3995_v25  ;;  %v1217_v48 = vsel %vm3755_vm6, %v2901_v22, %v1216_v33 }
  0xe9   : > { %v1290_v46 = vunpack.c.l.b16 %v1217_v48 }
  0xec   : > { %v4020_v56 = vpop.f32.mrf.mxu0 }
  0xed   : > { %v4022_v2 = vpop.f32.mrf.mxu3  ;;  %2940 = vmatmul.msk.bf16.gmra.mxu2 %vm753_vm3, %v4017_v28  ;;  %v1054_v3 = vpop.f32.mrf.mxu1 }
  0xee   : > { %4643 = vst [vmem:[#allocation30_spill] sm:$0xff] %v4022_v2  ;;  %v1055_v8 = vadd.f32 %v1054_v3, %v3894_v63  ;;  %v1220_v2 = vsel %vm3755_vm6, %v1218_v0, %v1219_v9  ;;  %v1223_v9 = vrot.slane %v3572_v42, 5 }
  0xef   : > { %v1291_v17 = vunpack.c.l.b16 %v1220_v2  ;;  %v1226_v2 = vrot.slane %v3579_v54, 5 }
  0xf0   : > { %v1401_v16 = vpop.f32.mrf.mxu2 }
  0xf1   : > { %v1481_v19 = vadd.f32 %v1401_v16, %v1053_v20  ;;  %v4045_v3 = vpack.c.b16 %v1291_v17, %v1290_v46  ;;  %v4052_v16 = vld [vmem:[%s3379_s25 + $0x78] sm:$0xff] }
  0xf2   : > { %2984 = vmatmul.msk.bf16.gmra.mxu3 %vm753_vm3, %v4028_v13 }
  0xf4   : > { %v1747_v28 = vpop.f32.mrf.mxu0 }
  0xf5   : > { %v1563_v52 = vpop.f32.mrf.mxu3  ;;  %v1057_v25 = vpop.f32.mrf.mxu1 }
  0xf6   : > { %v1643_v63 = vadd.f32 %v1563_v52, %v1481_v19  ;;  %v1058_v39 = vadd.f32 %v1057_v25, %v3909_v44 }
  0xf7   : > { %3024 = vmatmul.msk.bf16.gmra.mxu0 %vm753_vm3, %v3549_v10 }
  0xf8   : > { %v1403_v20 = vpop.f32.mrf.mxu2  ;;  %2885 = vmatmul.msk.bf16.gmra.mxu1 %vm753_vm3, %v4028_v13  ;;  %v4043_v22 = vadd.f32 %v1747_v28, %v1643_v63  ;;  %v2902_v28 = vrot.slane %v3568_v34, 9 }
  0xf9   : > { %v1482_v33 = vadd.f32 %v1403_v20, %v1055_v8  ;;  %v1225_v8 = vrot.slane %v1223_v9, 4 }
  0xfa   : > { %v1224_v54 = vsel %vm3755_vm6, %v2902_v28, %v1223_v9 }
  0xfb   : > { %v1227_v52 = vsel %vm3755_vm6, %v1225_v8, %v1226_v2 }
  0xfc   : > { %v1749_v0 = vpop.f32.mrf.mxu0 }
  0xfd   : > { %v1565_v19 = vpop.f32.mrf.mxu3  ;;  %2941 = vmatmul.msk.bf16.gmra.mxu2 %vm753_vm3, %v4045_v3  ;;  %v1059_v44 = vpop.f32.mrf.mxu1 }
  0xfe   : > { %v1644_v25 = vadd.f32 %v1565_v19, %v1482_v33  ;;  %v1060_v48 = vadd.f32 %v1059_v44, %v3930_v61  ;;  %v1292_v61 = vunpack.c.l.b16 %v1224_v54  ;;  %v1293_v19 = vunpack.c.l.b16 %v1227_v52 }
 0x100   : > { %v1406_v46 = vpop.f32.mrf.mxu2  ;;  %v4056_v17 = vadd.f32 %v1749_v0, %v1644_v25  ;;  %v4071_v2 = vpack.c.b16 %v1293_v19, %v1292_v61  ;;  %v4645_v25 = vld [vmem:[#allocation11_spill] sm:$0xff] }
 0x101   : > { %v1483_v42 = vadd.f32 %v1406_v46, %v1058_v39  ;;  %v1230_v28 = vrot.slane %v4645_v25, 5  ;;  %v4646_v46 = vld [vmem:[#allocation12_spill] sm:$0xff] }
 0x102   : > { %2985 = vmatmul.msk.bf16.gmra.mxu3 %vm753_vm3, %v4052_v16  ;;  %v1233_v54 = vrot.slane %v4646_v46, 5 }
 0x104   : > { %v1752_v63 = vpop.f32.mrf.mxu0 }
 0x105   : > { %v1568_v20 = vpop.f32.mrf.mxu3  ;;  %v1062_v33 = vpop.f32.mrf.mxu1 }
 0x106   : > { %v1645_v34 = vadd.f32 %v1568_v20, %v1483_v42  ;;  %v1063_v0 = vadd.f32 %v1062_v33, %v3952_v27  ;;  %v4078_v20 = vld [vmem:[%s3379_s25 + $0x84] sm:$0xff] }
 0x107   : > { %3025 = vmatmul.msk.bf16.gmra.mxu0 %vm753_vm3, %v3643_v29 }
 0x108   : > { %v1408_v39 = vpop.f32.mrf.mxu2  ;;  %2886 = vmatmul.msk.bf16.gmra.mxu1 %vm753_vm3, %v4052_v16  ;;  %v4069_v9 = vadd.f32 %v1752_v63, %v1645_v34  ;;  %v4647_v63 = vld [vmem:[#allocation9_spill] sm:$0xff] }
 0x109   : > { %v1484_v44 = vadd.f32 %v1408_v39, %v1060_v48  ;;  %v2903_v34 = vrot.slane %v4647_v63, 9  ;;  %v1232_v48 = vrot.slane %v1230_v28, 4 }
 0x10a   : > { %4644 = vst [vmem:[#allocation31_spill] sm:$0xff] %v4069_v9 }
 0x10b   : > { %v1231_v25 = vsel %vm3755_vm6, %v2903_v34, %v1230_v28  ;;  %v3247_v28 = vld [vmem:[%s4568_s1 + $0xe0] sm:$0xff] }
 0x10c   : > { %v1754_v8 = vpop.f32.mrf.mxu0  ;;  %2259 = vmatpush.bf16.msra.mxu3 %v3247_v28 }
 0x10d   : > { %v1570_v42 = vpop.f32.mrf.mxu3  ;;  %2942 = vmatmul.msk.bf16.gmra.mxu2 %vm753_vm3, %v4071_v2  ;;  %v1064_v27 = vpop.f32.mrf.mxu1 }
 0x10e   : > { %v1646_v52 = vadd.f32 %v1570_v42, %v1484_v44  ;;  %v1065_v33 = vadd.f32 %v1064_v27, %v3981_v51  ;;  %v1234_v44 = vsel %vm3755_vm6, %v1232_v48, %v1233_v54  ;;  %v3243_v51 = vld [vmem:[%s4568_s1 + $0xc0] sm:$0xff] }
 0x10f   : > { %2075 = vmatpush.bf16.msra.mxu2 %v3243_v51  ;;  %v3239_v54 = vld [vmem:[%s4568_s1 + $0xa0] sm:$0xff] }
 0x110   : > { %v1411_v61 = vpop.f32.mrf.mxu2  ;;  %v4082_v19 = vadd.f32 %v1754_v8, %v1646_v52  ;;  %v1294_v8 = vunpack.c.l.b16 %v1231_v25  ;;  %v1295_v52 = vunpack.c.l.b16 %v1234_v44  ;;  %1913 = vmatpush.bf16.msra.mxu1 %v3239_v54  ;;  %v3251_v51 = vld [vmem:[%s4568_s1 + $0x100] sm:$0xff] }
 0x111   : > { %v1485_v39 = vadd.f32 %v1411_v61, %v1063_v0  ;;  %2427 = vmatpush.bf16.msra.mxu0 %v3251_v51 }
 0x112   : > { %4648 = vst [vmem:[#allocation11_spill] sm:$0xff] %v4082_v19  ;;  %2986 = vmatmul.msk.bf16.gmra.mxu3 %vm753_vm3, %v4078_v20  ;;  %v4106_v61 = vpack.c.b16 %v1295_v52, %v1294_v8  ;;  %v3298_v52 = vld [vmem:[%s3379_s25 + $0x90] sm:$0xf] }
 0x113   : > { %v2904_v28 = vrot.slane %v3298_v52, 9 }
 0x114   : > { %v1757_v46 = vpop.f32.mrf.mxu0  ;;  %4650 = vst [vmem:[#allocation9_spill] sm:$0xff] %v4106_v61 }
 0x115   : > { %v1573_v42 = vpop.f32.mrf.mxu3  ;;  %v1067_v27 = vpop.f32.mrf.mxu1 }
 0x116   : > { %v1647_v0 = vadd.f32 %v1573_v42, %v1485_v39  ;;  %v1068_v63 = vadd.f32 %v1067_v27, %v4006_v47  ;;  %v3296_v39 = vld [vmem:[%s3379_s25 + $0x94] sm:$0xf]  ;;  %v3297_v42 = vld [vmem:[%s3379_s25 + $0x98] sm:$0x1] }
 0x117   : > { %3026 = vmatmul.msk.bf16.gmra.mxu0 %vm753_vm3, %v3746_v15  ;;  %v1237_v25 = vrot.slane %v3296_v39, 5  ;;  %v1240_v27 = vrot.slane %v3297_v42, 5  ;;  %v3301_v15 = vld [vmem:[%s3379_s25 + $0x9c] sm:$0xf] }
 0x118   : > { %v1413_v34 = vpop.f32.mrf.mxu2  ;;  %2887 = vmatmul.msk.bf16.gmra.mxu1 %vm753_vm3, %v4078_v20  ;;  %v4104_v48 = vadd.f32 %v1757_v46, %v1647_v0  ;;  %v4116_v0 = vld [vmem:[%s3379_s25 + $0x90] sm:$0xff] }
 0x119   : > { %v1486_v47 = vadd.f32 %v1413_v34, %v1065_v33  ;;  %4651 = vst [vmem:[#allocation32_spill] sm:$0xff] %v4116_v0  ;;  %v1239_v54 = vrot.slane %v1237_v25, 4  ;;  %v1238_v42 = vsel %vm3755_vm6, %v2904_v28, %v1237_v25  ;;  %v3299_v28 = vld [vmem:[%s3379_s25 + $0xa0] sm:$0xf] }
 0x11a   : > { %4649 = vst [vmem:[#allocation12_spill] sm:$0xff] %v4104_v48  ;;  %v1296_v52 = vunpack.c.l.b16 %v1238_v42 }
 0x11c   : > { %v1759_v44 = vpop.f32.mrf.mxu0 }
 0x11d   : > { %v1575_v19 = vpop.f32.mrf.mxu3  ;;  %2943 = vmatmul.msk.bf16.gmra.mxu2 %vm753_vm3, %v4106_v61  ;;  %v1069_v46 = vpop.f32.mrf.mxu1 }
 0x11e   : > { %v1648_v33 = vadd.f32 %v1575_v19, %v1486_v47  ;;  %v1070_v8 = vadd.f32 %v1069_v46, %v4020_v56  ;;  %v1241_v19 = vsel %vm3755_vm6, %v1239_v54, %v1240_v27  ;;  %v1244_v54 = vrot.slane %v3299_v28, 5 }
 0x11f   : > { %v1297_v51 = vunpack.c.l.b16 %v1241_v19  ;;  %v3300_v19 = vld [vmem:[%s3379_s25 + $0xa4] sm:$0x1] }
 0x120   : > { %v1416_v34 = vpop.f32.mrf.mxu2  ;;  %v4120_v39 = vadd.f32 %v1759_v44, %v1648_v33  ;;  %v4653_v44 = vld [vmem:[#allocation3_spill] sm:$0xff] }
 0x121   : > { %v1487_v48 = vadd.f32 %v1416_v34, %v1068_v63  ;;  %v4134_v27 = vpack.c.b16 %v1297_v51, %v1296_v52 }
 0x122   : > { %4652 = vst [vmem:[#allocation33_spill] sm:$0xff] %v4120_v39  ;;  %2987 = vmatmul.msk.bf16.gmra.mxu3 %vm753_vm3, %v4116_v0 }
 0x123   : > { %4655 = vst [vmem:[#allocation35_spill] sm:$0xff] %v4134_v27 }
 0x124   : > { %v1762_v47 = vpop.f32.mrf.mxu0 }
 0x125   : > { %v1578_v56 = vpop.f32.mrf.mxu3  ;;  %v1072_v46 = vpop.f32.mrf.mxu1 }
 0x126   : > { %v1649_v61 = vadd.f32 %v1578_v56, %v1487_v48  ;;  %v1247_v56 = vrot.slane %v3300_v19, 5 }
 0x127   : > { %3027 = vmatmul.msk.bf16.gmra.mxu0 %vm753_vm3, %v4653_v44  ;;  %v4141_v44 = vld [vmem:[%s3379_s25 + $0x9c] sm:$0xff] }
 0x128   : > { %v1418_v63 = vpop.f32.mrf.mxu2  ;;  %2888 = vmatmul.msk.bf16.gmra.mxu1 %vm753_vm3, %v4116_v0  ;;  %v4132_v25 = vadd.f32 %v1762_v47, %v1649_v61  ;;  %4656 = vst [vmem:[#allocation36_spill] sm:$0xff] %v4141_v44  ;;  %v2905_v0 = vrot.slane %v3301_v15, 9  ;;  %v1246_v61 = vrot.slane %v1244_v54, 4 }
 0x129   : > { %v1488_v33 = vadd.f32 %v1418_v63, %v1070_v8  ;;  %v1073_v8 = vadd.f32 %v1072_v46, %v3847_v21  ;;  %v4658_v46 = vld [vmem:[#allocation4_spill] sm:$0xff] }
 0x12a   : > { %4654 = vst [vmem:[#allocation34_spill] sm:$0xff] %v4132_v25  ;;  %v1245_v63 = vsel %vm3755_vm6, %v2905_v0, %v1244_v54 }
 0x12b   : > { %v1298_v15 = vunpack.c.l.b16 %v1245_v63 }
 0x12c   : > { %v1764_v34 = vpop.f32.mrf.mxu0 }
 0x12d   : > { %v1580_v42 = vpop.f32.mrf.mxu3  ;;  %2944 = vmatmul.msk.bf16.gmra.mxu2 %vm753_vm3, %v4134_v27  ;;  %v1074_v48 = vpop.f32.mrf.mxu1 }
 0x12e   : > { %v1650_v39 = vadd.f32 %v1580_v42, %v1488_v33  ;;  %v1248_v33 = vsel %vm3755_vm6, %v1246_v61, %v1247_v56  ;;  %v4661_v61 = vld [vmem:[#allocation6_spill] sm:$0xff] }
 0x12f   : > { %v1299_v25 = vunpack.c.l.b16 %v1248_v33  ;;  %v4662_v33 = vld [vmem:[#allocation7_spill] sm:$0xff] }
 0x130   : > { %v1421_v47 = vpop.f32.mrf.mxu2  ;;  %v4145_v52 = vadd.f32 %v1764_v34, %v1650_v39  ;;  %v1075_v39 = vadd.f32 %v1074_v48, %v3862_v14  ;;  %v4167_v48 = vld [vmem:[%s3379_s25 + $0xa8] sm:$0xff] }
 0x131   : > { %v1489_v51 = vadd.f32 %v1421_v47, %v1073_v8  ;;  %v4160_v56 = vpack.c.b16 %v1299_v25, %v1298_v15  ;;  %v1251_v8 = vrot.slane %v4661_v61, 5  ;;  %4663 = vst [vmem:[#allocation6_spill] sm:$0xff] %v4167_v48 }
 0x132   : > { %4657 = vst [vmem:[#allocation37_spill] sm:$0xff] %v4145_v52  ;;  %2988 = vmatmul.msk.bf16.gmra.mxu3 %vm753_vm3, %v4141_v44  ;;  %v4664_v52 = vld [vmem:[#allocation5_spill] sm:$0xff] }
 0x133   : > { %4660 = vst [vmem:[#allocation39_spill] sm:$0xff] %v4160_v56 }
 0x134   : > { %v1767_v28 = vpop.f32.mrf.mxu0 }
 0x135   : > { %v1583_v42 = vpop.f32.mrf.mxu3  ;;  %v1077_v19 = vpop.f32.mrf.mxu1 }
 0x136   : > { %v1651_v21 = vadd.f32 %v1583_v42, %v1489_v51  ;;  %v1254_v42 = vrot.slane %v4662_v33, 5 }
 0x137   : > { %3028 = vmatmul.msk.bf16.gmra.mxu0 %vm753_vm3, %v4658_v46  ;;  %v2906_v46 = vrot.slane %v4664_v52, 9 }
 0x138   : > { %v1423_v34 = vpop.f32.mrf.mxu2  ;;  %2889 = vmatmul.msk.bf16.gmra.mxu1 %vm753_vm3, %v4141_v44  ;;  %v4158_v0 = vadd.f32 %v1767_v28, %v1651_v21  ;;  %v1253_v28 = vrot.slane %v1251_v8, 4  ;;  %v1078_v21 = vadd.f32 %v1077_v19, %v3882_v35 }
 0x139   : > { %v1490_v54 = vadd.f32 %v1423_v34, %v1075_v39  ;;  %v1252_v34 = vsel %vm3755_vm6, %v2906_v46, %v1251_v8  ;;  %v4185_v46 = vld [vmem:[%s3379_s25 + $0xc0] sm:$0xf] }
 0x13a   : > { %4659 = vst [vmem:[#allocation38_spill] sm:$0xff] %v4158_v0  ;;  %v1300_v33 = vunpack.c.l.b16 %v1252_v34  ;;  %v4666_v0 = vld [vmem:[#allocation10_spill] sm:$0xff]  ;;  %v1676_v34 = vshrl.u32 %v4185_v46, 16 }
 0x13b   : > { %4667 = vst [vmem:[#allocation5_spill] sm:$0xff] %v4185_v46 }
 0x13c   : > { %v1769_v47 = vpop.f32.mrf.mxu0 }
 0x13d   : > { %v1585_v63 = vpop.f32.mrf.mxu3  ;;  %2945 = vmatmul.msk.bf16.gmra.mxu2 %vm753_vm3, %v4160_v56  ;;  %v1079_v51 = vpop.f32.mrf.mxu1 }
 0x13e   : > { %v1652_v14 = vadd.f32 %v1585_v63, %v1490_v54  ;;  %v1255_v54 = vsel %vm3755_vm6, %v1253_v28, %v1254_v42 }
 0x13f   : > { %v1301_v35 = vunpack.c.l.b16 %v1255_v54 }
 0x140   : > { %v1426_v25 = vpop.f32.mrf.mxu2  ;;  %v4171_v15 = vadd.f32 %v1769_v47, %v1652_v14  ;;  %v1080_v47 = vadd.f32 %v1079_v51, %v3900_v30  ;;  %v1679_v30 = vshll.u32 %v4185_v46, 16 }
 0x141   : > { %v1491_v39 = vadd.f32 %v1426_v25, %v1078_v21  ;;  %v4189_v28 = vpack.c.b16 %v1301_v35, %v1300_v33  ;;  %v4192_v21 = vld [vmem:[%s3379_s25 + $0xc4] sm:$0xf]  ;;  %v4672_v33 = vld [vmem:[#allocation15_spill] sm:$0xff] }
 0x142   : > { %4665 = vst [vmem:[#allocation7_spill] sm:$0xff] %v4171_v15  ;;  %2989 = vmatmul.msk.bf16.gmra.mxu3 %vm753_vm3, %v4167_v48  ;;  %v4671_v25 = vld [vmem:[#allocation14_spill] sm:$0xff]  ;;  %v1685_v51 = vshll.u32 %v4192_v21, 16  ;;  %v1261_v35 = vrot.slane %v4672_v33, 5  ;;  %v1681_v56 = vrot.slane %v1679_v30, 5 }
 0x143   : > { %4669 = vst [vmem:[#allocation41_spill] sm:$0xff] %v4189_v28 }
 0x144   : > { %v1772_v61 = vpop.f32.mrf.mxu0  ;;  %4670 = vst [vmem:[#allocation42_spill] sm:$0xff] %v4192_v21 }
 0x145   : > { %v1588_v52 = vpop.f32.mrf.mxu3  ;;  %v1082_v63 = vpop.f32.mrf.mxu1 }
 0x146   : > { %v1653_v19 = vadd.f32 %v1588_v52, %v1491_v39  ;;  %v1258_v39 = vrot.slane %v4671_v25, 5  ;;  %v1689_v52 = vshrl.u32 %v4192_v21, 16  ;;  %v1083_v46 = vadd.f32 %v1082_v63, %v3920_v4 }
 0x147   : > { %3029 = vmatmul.msk.bf16.gmra.mxu0 %vm753_vm3, %v4666_v0  ;;  %v1678_v0 = vrot.slane %v1676_v34, 4  ;;  %v1687_v21 = vrot.slane %v1685_v51, 5 }
 0x148   : > { %v1428_v14 = vpop.f32.mrf.mxu2  ;;  %2890 = vmatmul.msk.bf16.gmra.mxu1 %vm753_vm3, %v4167_v48  ;;  %v4187_v8 = vadd.f32 %v1772_v61, %v1653_v19  ;;  %v1691_v44 = vrot.slane %v1689_v52, 4 }
 0x149   : > { %v1492_v42 = vadd.f32 %v1428_v14, %v1080_v47  ;;  %v4203_v47 = vld [vmem:[%s3379_s25 + $0xb4] sm:$0xff]  ;;  %v1682_v63 = vor.u32 %v1681_v56, %v1678_v0 }
 0x14a   : > { %4668 = vst [vmem:[#allocation40_spill] sm:$0xff] %v4187_v8  ;;  %v4673_v14 = vld [vmem:[#allocation13_spill] sm:$0xff]  ;;  %v1260_v8 = vrot.slane %v1258_v39, 4  ;;  %v1692_v34 = vor.u32 %v1691_v44, %v1687_v21 }
 0x14b   : > { %v2907_v25 = vrot.slane %v4673_v14, 9 }
 0x14c   : > { %v1774_v54 = vpop.f32.mrf.mxu0  ;;  %v1693_v0 = vrot.slane %v1692_v34, 4 }
 0x14d   : > { %v1590_v15 = vpop.f32.mrf.mxu3  ;;  %2946 = vmatmul.msk.bf16.gmra.mxu2 %vm753_vm3, %v4189_v28  ;;  %v1084_v61 = vpop.f32.mrf.mxu1  ;;  %v4210_v28 = vld [vmem:[%s3379_s25 + $0xc8] sm:$0x1] }
 0x14e   : > { %v1654_v19 = vadd.f32 %v1590_v15, %v1492_v42  ;;  %v1259_v15 = vsel %vm3755_vm6, %v2907_v25, %v1258_v39  ;;  %v1262_v42 = vsel %vm3755_vm6, %v1260_v8, %v1261_v35  ;;  %v1695_v30 = vshll.u32 %v4210_v28, 16 }
 0x14f   : > { %v1302_v52 = vunpack.c.l.b16 %v1259_v15  ;;  %v1085_v33 = vadd.f32 %v1084_v61, %v3941_v41  ;;  %v1683_v8 = vrot.slane %v1682_v63, 4 }
 0x150   : > { %v1431_v48 = vpop.f32.mrf.mxu2  ;;  %v4207_v27 = vadd.f32 %v1774_v54, %v1654_v19  ;;  %v1697_v44 = vrot.slane %v1695_v30, 5 }
 0x151   : > { %v1493_v9 = vadd.f32 %v1431_v48, %v1083_v46  ;;  %v1303_v48 = vunpack.c.l.b16 %v1262_v42  ;;  %v4235_v42 = vld [vmem:[%s3379_s25 + $0xc0] sm:$0xff] }
 0x152   : > { %2990 = vmatmul.msk.bf16.gmra.mxu3 %vm753_vm3, %v4203_v47  ;;  %v1698_v41 = vsel %vm3411_vm2, %v1693_v0, %v1697_v44 }
 0x153   : > { %v4226_v19 = vpack.c.b16 %v1303_v48, %v1302_v52  ;;  %v1709_v34 = vunpack.c.l.b16 %v1698_v41 }
 0x154   : > { %v1777_v4 = vpop.f32.mrf.mxu0 }
 0x155   : > { %v1593_v51 = vpop.f32.mrf.mxu3  ;;  %v1087_v54 = vpop.f32.mrf.mxu1 }
 0x156   : > { %v1655_v46 = vadd.f32 %v1593_v51, %v1493_v9  ;;  %v1688_v9 = vsel %vm3411_vm2, %v1683_v8, %v1687_v21 }
 0x157   : > { %3030 = vmatmul.msk.bf16.gmra.mxu0 %vm753_vm3, %v3764_v12  ;;  %v1708_v63 = vunpack.c.l.b16 %v1688_v9 }
 0x158   : > { %v1433_v39 = vpop.f32.mrf.mxu2  ;;  %2891 = vmatmul.msk.bf16.gmra.mxu1 %vm753_vm3, %v4203_v47  ;;  %v4224_v56 = vadd.f32 %v1777_v4, %v1655_v46  ;;  %v1088_v4 = vadd.f32 %v1087_v54, %v3965_v11 }
 0x159   : > { %v1494_v35 = vadd.f32 %v1433_v39, %v1085_v33  ;;  %v4242_v21 = vpack.c.b16 %v1709_v34, %v1708_v63 }
 0x15c   : > { %v1779_v14 = vpop.f32.mrf.mxu0 }
 0x15d   : > { %v1595_v61 = vpop.f32.mrf.mxu3  ;;  %2947 = vmatmul.msk.bf16.gmra.mxu2 %vm753_vm3, %v4226_v19  ;;  %v1089_v25 = vpop.f32.mrf.mxu1 }
 0x15e   : > { %v1656_v15 = vadd.f32 %v1595_v61, %v1494_v35  ;;  %v1090_v11 = vadd.f32 %v1089_v25, %v3991_v50 }
 0x160   : > { %v1436_v30 = vpop.f32.mrf.mxu2  ;;  %v4238_v51 = vadd.f32 %v1779_v14, %v1656_v15 }
 0x161   : > { %v1495_v52 = vadd.f32 %v1436_v30, %v1088_v4 }
 0x162   : > { %2991 = vmatmul.msk.bf16.gmra.mxu3 %vm753_vm3, %v4235_v42 }
 0x164   : > { %v1782_v48 = vpop.f32.mrf.mxu0 }
 0x165   : > { %v1598_v46 = vpop.f32.mrf.mxu3  ;;  %v1092_v33 = vpop.f32.mrf.mxu1 }
 0x166   : > { %v1657_v39 = vadd.f32 %v1598_v46, %v1495_v52  ;;  %v1093_v41 = vadd.f32 %v1092_v33, %v3864_v43 }
 0x167   : > { %3031 = vmatmul.msk.bf16.gmra.mxu0 %vm753_vm3, %v4242_v21 }
 0x168   : > { %v1438_v54 = vpop.f32.mrf.mxu2  ;;  %3057 = vmatmul.msk.bf16.vlgmr.msra.gmra.mxu1 %vm753_vm3, %v3785_v37  ;;  %v4249_v8 = vadd.f32 %v1782_v48, %v1657_v39 }
 0x169   : > { %v1496_v0 = vadd.f32 %v1438_v54, %v1090_v11 }
 0x16c   : > { %v1784_v44 = vpop.f32.mrf.mxu0 }
 0x16d   : > { %v1600_v35 = vpop.f32.mrf.mxu3  ;;  %3101 = vmatmul.msk.bf16.vlgmr.msra.gmra.mxu2 %vm753_vm3, %v3798_v23  ;;  %v1094_v14 = vpop.f32.mrf.mxu1 }
 0x16e   : > { %v1658_v9 = vadd.f32 %v1600_v35, %v1496_v0  ;;  %v1095_v23 = vadd.f32 %v1094_v14, %v3886_v24 }
 0x170   : > { %v1441_v61 = vpop.f32.mrf.mxu2  ;;  %v4254_v15 = vadd.f32 %v1784_v44, %v1658_v9 }
 0x171   : > { %v1497_v50 = vadd.f32 %v1441_v61, %v1093_v41 }
 0x172   : > { %3141 = vmatmul.msk.bf16.vlgmr.msra.gmra.mxu3 %vm753_vm3, %v3693_v55 }
 0x174   : > { %v1787_v37 = vpop.f32.mrf.mxu0 }
 0x175   : > { %v1603_v25 = vpop.f32.mrf.mxu3  ;;  %v1097_v4 = vpop.f32.mrf.mxu1 }
 0x176   : > { %v1659_v63 = vadd.f32 %v1603_v25, %v1497_v50  ;;  %v1098_v33 = vadd.f32 %v1097_v4, %v3906_v58 }
 0x177   : > { %3182 = vmatmul.msk.bf16.vlgmr.msra.gmra.mxu0 %vm753_vm3, %v3812_v53 }
 0x178   : > { %v1443_v34 = vpop.f32.mrf.mxu2  ;;  %3058 = vmatmul.msk.bf16.gmra.mxu1 %vm753_vm3, %v3812_v53  ;;  %v4263_v43 = vadd.f32 %v1787_v37, %v1659_v63 }
 0x179   : > { %v1498_v30 = vadd.f32 %v1443_v34, %v1095_v23 }
 0x17c   : > { %v1789_v52 = vpop.f32.mrf.mxu0 }
 0x17d   : > { %v1605_v48 = vpop.f32.mrf.mxu3  ;;  %3102 = vmatmul.msk.bf16.gmra.mxu2 %vm753_vm3, %v3818_v59  ;;  %v1099_v55 = vpop.f32.mrf.mxu1 }
 0x17e   : > { %v1660_v46 = vadd.f32 %v1605_v48, %v1498_v30  ;;  %v1100_v59 = vadd.f32 %v1099_v55, %v3924_v62 }
 0x180   : > { %v1446_v39 = vpop.f32.mrf.mxu2  ;;  %v4268_v11 = vadd.f32 %v1789_v52, %v1660_v46 }
 0x181   : > { %v1499_v24 = vadd.f32 %v1446_v39, %v1098_v33 }
 0x182   : > { %3142 = vmatmul.msk.bf16.gmra.mxu3 %vm753_vm3, %v3781_v36 }
 0x184   : > { %v1792_v53 = vpop.f32.mrf.mxu0 }
 0x185   : > { %v1608_v54 = vpop.f32.mrf.mxu3  ;;  %v1102_v0 = vpop.f32.mrf.mxu1 }
 0x186   : > { %v1661_v44 = vadd.f32 %v1608_v54, %v1499_v24  ;;  %v1103_v50 = vadd.f32 %v1102_v0, %v3943_v18 }
 0x187   : > { %3183 = vmatmul.msk.bf16.gmra.mxu0 %vm753_vm3, %v3844_v26 }
 0x188   : > { %v1448_v35 = vpop.f32.mrf.mxu2  ;;  %3059 = vmatmul.msk.bf16.gmra.mxu1 %vm753_vm3, %v3844_v26  ;;  %v4277_v58 = vadd.f32 %v1792_v53, %v1661_v44 }
 0x189   : > { %v1500_v14 = vadd.f32 %v1448_v35, %v1100_v59 }
 0x18c   : > { %v1794_v9 = vpop.f32.mrf.mxu0 }
 0x18d   : > { %v1610_v41 = vpop.f32.mrf.mxu3  ;;  %3103 = vmatmul.msk.bf16.gmra.mxu2 %vm753_vm3, %v3852_v6  ;;  %v1104_v36 = vpop.f32.mrf.mxu1 }
 0x18e   : > { %v1662_v61 = vadd.f32 %v1610_v41, %v1500_v14  ;;  %v1105_v6 = vadd.f32 %v1104_v36, %v3967_v40 }
 0x190   : > { %v1451_v37 = vpop.f32.mrf.mxu2  ;;  %v4282_v25 = vadd.f32 %v1794_v9, %v1662_v61  ;;  %v4674_v9 = vld [vmem:[#allocation18_spill] sm:$0xff] }
 0x191   : > { %v1501_v62 = vadd.f32 %v1451_v37, %v1103_v50  ;;  %v4675_v50 = vld [vmem:[#allocation8_spill] sm:$0xff] }
 0x192   : > { %3143 = vmatmul.msk.bf16.gmra.mxu3 %vm753_vm3, %v3429_v60 }
 0x194   : > { %v1797_v26 = vpop.f32.mrf.mxu0 }
 0x195   : > { %v1613_v4 = vpop.f32.mrf.mxu3  ;;  %v1107_v63 = vpop.f32.mrf.mxu1 }
 0x196   : > { %v1663_v23 = vadd.f32 %v1613_v4, %v1501_v62  ;;  %v1108_v46 = vadd.f32 %v1107_v63, %v3998_v45  ;;  %v4676_v4 = vld [vmem:[#allocation22_spill] sm:$0xff]  ;;  %v4677_v63 = vld [vmem:[#allocation19_spill] sm:$0xff] }
 0x197   : > { %3184 = vmatmul.msk.bf16.gmra.mxu0 %vm753_vm3, %v3872_v5 }
 0x198   : > { %v1453_v34 = vpop.f32.mrf.mxu2  ;;  %3060 = vmatmul.msk.bf16.gmra.mxu1 %vm753_vm3, %v3872_v5  ;;  %v4291_v18 = vadd.f32 %v1797_v26, %v1663_v23 }
 0x199   : > { %v1502_v30 = vadd.f32 %v1453_v34, %v1105_v6 }
 0x19c   : > { %v1799_v52 = vpop.f32.mrf.mxu0 }
 0x19d   : > { %v1615_v48 = vpop.f32.mrf.mxu3  ;;  %3104 = vmatmul.msk.bf16.gmra.mxu2 %vm753_vm3, %v3880_v1  ;;  %v1109_v60 = vpop.f32.mrf.mxu1 }
 0x19e   : > { %v1664_v55 = vadd.f32 %v1615_v48, %v1502_v30  ;;  %v1110_v1 = vadd.f32 %v1109_v60, %v4013_v57  ;;  %v4678_v48 = vld [vmem:[#allocation23_spill] sm:$0xff] }
 0x1a0   : > { %v1456_v33 = vpop.f32.mrf.mxu2  ;;  %v4296_v39 = vadd.f32 %v1799_v52, %v1664_v55 }
 0x1a1   : > { %v1503_v40 = vadd.f32 %v1456_v33, %v1108_v46  ;;  %v4679_v46 = vld [vmem:[#allocation20_spill] sm:$0xff] }
 0x1a2   : > { %3144 = vmatmul.msk.bf16.gmra.mxu3 %vm753_vm3, %v3518_v38 }
 0x1a4   : > { %v1802_v5 = vpop.f32.mrf.mxu0 }
 0x1a5   : > { %v1618_v24 = vpop.f32.mrf.mxu3  ;;  %v1112_v53 = vpop.f32.mrf.mxu1 }
 0x1a6   : > { %v1665_v54 = vadd.f32 %v1618_v24, %v1503_v40  ;;  %v1113_v41 = vadd.f32 %v1112_v53, %v4674_v9  ;;  %v4680_v53 = vld [vmem:[#allocation16_spill] sm:$0xff] }
 0x1a7   : > { %3185 = vmatmul.msk.bf16.gmra.mxu0 %vm753_vm3, %v3904_v31 }
 0x1a8   : > { %v1458_v0 = vpop.f32.mrf.mxu2  ;;  %3061 = vmatmul.msk.bf16.gmra.mxu1 %vm753_vm3, %v3904_v31  ;;  %v4305_v45 = vadd.f32 %v1802_v5, %v1665_v54 }
 0x1a9   : > { %v1504_v44 = vadd.f32 %v1458_v0, %v1110_v1 }
 0x1ac   : > { %v1804_v59 = vpop.f32.mrf.mxu0 }
 0x1ad   : > { %v1620_v35 = vpop.f32.mrf.mxu3  ;;  %3105 = vmatmul.msk.bf16.gmra.mxu2 %vm753_vm3, %v3914_v49  ;;  %v1114_v38 = vpop.f32.mrf.mxu1 }
 0x1ae   : > { %v1666_v14 = vadd.f32 %v1620_v35, %v1504_v44  ;;  %v1115_v49 = vadd.f32 %v1114_v38, %v4677_v63  ;;  %v4682_v35 = vld [vmem:[#allocation21_spill] sm:$0xff] }
 0x1b0   : > { %v1461_v36 = vpop.f32.mrf.mxu2  ;;  %v4310_v61 = vadd.f32 %v1804_v59, %v1666_v14  ;;  %v4681_v59 = vld [vmem:[#allocation25_spill] sm:$0xff] }
 0x1b1   : > { %v1505_v57 = vadd.f32 %v1461_v36, %v1113_v41 }
 0x1b2   : > { %3145 = vmatmul.msk.bf16.gmra.mxu3 %vm753_vm3, %v4675_v50  ;;  %v4683_v50 = vld [vmem:[#allocation27_spill] sm:$0xff] }
 0x1b4   : > { %v1807_v31 = vpop.f32.mrf.mxu0 }
 0x1b5   : > { %v1623_v37 = vpop.f32.mrf.mxu3  ;;  %v1117_v62 = vpop.f32.mrf.mxu1 }
 0x1b6   : > { %v1667_v26 = vadd.f32 %v1623_v37, %v1505_v57  ;;  %v1118_v33 = vadd.f32 %v1117_v62, %v4679_v46  ;;  %v4684_v62 = vld [vmem:[#allocation24_spill] sm:$0xff] }
 0x1b7   : > { %3186 = vmatmul.msk.bf16.gmra.mxu0 %vm753_vm3, %v4676_v4 }
 0x1b8   : > { %v1463_v23 = vpop.f32.mrf.mxu2  ;;  %3062 = vmatmul.msk.bf16.gmra.mxu1 %vm753_vm3, %v4676_v4  ;;  %v4319_v6 = vadd.f32 %v1807_v31, %v1667_v26 }
 0x1b9   : > { %v1506_v34 = vadd.f32 %v1463_v23, %v1115_v49  ;;  %v4685_v23 = vld [vmem:[#allocation2_spill] sm:$0xff] }
 0x1bc   : > { %v1809_v30 = vpop.f32.mrf.mxu0 }
 0x1bd   : > { %v1625_v52 = vpop.f32.mrf.mxu3  ;;  %3106 = vmatmul.msk.bf16.gmra.mxu2 %vm753_vm3, %v4678_v48  ;;  %v1119_v60 = vpop.f32.mrf.mxu1 }
 0x1be   : > { %v1668_v55 = vadd.f32 %v1625_v52, %v1506_v34  ;;  %v1120_v38 = vadd.f32 %v1119_v60, %v4682_v35  ;;  %v4686_v60 = vld [vmem:[#allocation29_spill] sm:$0xff] }
 0x1c0   : > { %v1466_v40 = vpop.f32.mrf.mxu2  ;;  %v4324_v5 = vadd.f32 %v1809_v30, %v1668_v55  ;;  %v4687_v55 = vld [vmem:[#allocation26_spill] sm:$0xff] }
 0x1c1   : > { %v1507_v24 = vadd.f32 %v1466_v40, %v1118_v33 }
 0x1c2   : > { %3146 = vmatmul.msk.bf16.gmra.mxu3 %vm753_vm3, %v4680_v53 }
 0x1c4   : > { %v1812_v54 = vpop.f32.mrf.mxu0 }
 0x1c5   : > { %v1628_v1 = vpop.f32.mrf.mxu3  ;;  %v1122_v0 = vpop.f32.mrf.mxu1 }
 0x1c6   : > { %v1669_v44 = vadd.f32 %v1628_v1, %v1507_v24  ;;  %v1123_v26 = vadd.f32 %v1122_v0, %v4684_v62 }
 0x1c7   : > { %3187 = vmatmul.msk.bf16.gmra.mxu0 %vm753_vm3, %v4681_v59 }
 0x1c8   : > { %v1468_v14 = vpop.f32.mrf.mxu2  ;;  %3063 = vmatmul.msk.bf16.gmra.mxu1 %vm753_vm3, %v4681_v59  ;;  %v4333_v9 = vadd.f32 %v1812_v54, %v1669_v44  ;;  %v4688_v44 = vld [vmem:[#allocation28_spill] sm:$0xff] }
 0x1c9   : > { %v1508_v41 = vadd.f32 %v1468_v14, %v1120_v38 }
 0x1cc   : > { %v1814_v36 = vpop.f32.mrf.mxu0 }
 0x1cd   : > { %v1630_v57 = vpop.f32.mrf.mxu3  ;;  %3107 = vmatmul.msk.bf16.gmra.mxu2 %vm753_vm3, %v4683_v50  ;;  %v1124_v31 = vpop.f32.mrf.mxu1 }
 0x1ce   : > { %v1670_v37 = vadd.f32 %v1630_v57, %v1508_v41  ;;  %v1125_v46 = vadd.f32 %v1124_v31, %v4687_v55  ;;  %v4689_v31 = vld [vmem:[#allocation30_spill] sm:$0xff] }
 0x1d0   : > { %v1471_v4 = vpop.f32.mrf.mxu2  ;;  %v4338_v63 = vadd.f32 %v1814_v36, %v1670_v37 }
 0x1d1   : > { %v1509_v49 = vadd.f32 %v1471_v4, %v1123_v26 }
 0x1d2   : > { %3147 = vmatmul.msk.bf16.gmra.mxu3 %vm753_vm3, %v4685_v23 }
 0x1d4   : > { %v1817_v34 = vpop.f32.mrf.mxu0 }
 0x1d5   : > { %v1633_v30 = vpop.f32.mrf.mxu3  ;;  %v1127_v52 = vpop.f32.mrf.mxu1 }
 0x1d6   : > { %v1671_v48 = vadd.f32 %v1633_v30, %v1509_v49  ;;  %v1128_v59 = vadd.f32 %v1127_v52, %v4688_v44 }
 0x1d7   : > { %3188 = vmatmul.msk.bf16.gmra.mxu0 %vm753_vm3, %v4686_v60 }
 0x1d8   : > { %v1473_v33 = vpop.f32.mrf.mxu2  ;;  %3064 = vmatmul.msk.bf16.gmra.mxu1 %vm753_vm3, %v4686_v60  ;;  %v4347_v40 = vadd.f32 %v1817_v34, %v1671_v48 }
 0x1d9   : > { %v1510_v24 = vadd.f32 %v1473_v33, %v1125_v46  ;;  %v4373_v33 = vld [vmem:[%s4569_s2] ss:$0 sm:$0xff] }
 0x1dc   : > { %v1819_v53 = vpop.f32.mrf.mxu0 }
 0x1dd   : > { %v1635_v54 = vpop.f32.mrf.mxu3  ;;  %3108 = vmatmul.msk.bf16.gmra.mxu2 %vm753_vm3, %v4028_v13  ;;  %v1129_v1 = vpop.f32.mrf.mxu1 }
 0x1de   : > { %v1672_v0 = vadd.f32 %v1635_v54, %v1510_v24  ;;  %v1130_v13 = vadd.f32 %v1129_v1, %v4689_v31 }
 0x1e0   : > { %v1476_v35 = vpop.f32.mrf.mxu2  ;;  %v4352_v38 = vadd.f32 %v1819_v53, %v1672_v0 }
 0x1e1   : > { %v1511_v14 = vadd.f32 %v1476_v35, %v1128_v59  ;;  %v4690_v59 = vld [vmem:[#allocation31_spill] sm:$0xff] }
 0x1e2   : > { %3148 = vmatmul.msk.bf16.gmra.mxu3 %vm753_vm3, %v3549_v10 }
 0x1e4   : > { %v1822_v41 = vpop.f32.mrf.mxu0 }
 0x1e5   : > { %v1638_v36 = vpop.f32.mrf.mxu3  ;;  %v1915_v57 = vpop.f32.mrf.mxu1 }
 0x1e6   : > { %v1673_v50 = vadd.f32 %v1638_v36, %v1511_v14  ;;  %v1995_v34 = vadd.f32 %v1915_v57, %v4043_v22  ;;  %v4691_v36 = vld [vmem:[#allocation17_spill] sm:$0xff] }
 0x1e7   : > { %3189 = vmatmul.msk.bf16.gmra.mxu0 %vm753_vm3, %v4045_v3 }
 0x1e8   : > { %v1478_v37 = vpop.f32.mrf.mxu2  ;;  %3065 = vmatmul.msk.bf16.gmra.mxu1 %vm753_vm3, %v4045_v3  ;;  %v4361_v62 = vadd.f32 %v1822_v41, %v1673_v50 }
 0x1e9   : > { %v1512_v26 = vadd.f32 %v1478_v37, %v1130_v13 }
 0x1ec   : > { %v1824_v4 = vpop.f32.mrf.mxu0 }
 0x1ed   : > { %v1640_v49 = vpop.f32.mrf.mxu3  ;;  %3109 = vmatmul.msk.bf16.gmra.mxu2 %vm753_vm3, %v4052_v16  ;;  %v1917_v10 = vpop.f32.mrf.mxu1 }
 0x1ee   : > { %v1674_v23 = vadd.f32 %v1640_v49, %v1512_v26  ;;  %v1996_v16 = vadd.f32 %v1917_v10, %v4056_v17  ;;  %v4692_v26 = vld [vmem:[#allocation9_spill] sm:$0xff]  ;;  %v4693_v49 = vld [vmem:[#allocation11_spill] sm:$0xff] }
 0x1f0   : > { %v2077_v30 = vpop.f32.mrf.mxu2  ;;  %v4366_v52 = vadd.f32 %v1824_v4, %v1674_v23 }
 0x1f1   : > { %v2157_v3 = vadd.f32 %v2077_v30, %v1995_v34 }
 0x1f2   : > { %3149 = vmatmul.msk.bf16.gmra.mxu3 %vm753_vm3, %v3643_v29 }
 0x1f4   : > { %v2429_v48 = vpop.f32.mrf.mxu0 }
 0x1f5   : > { %v2261_v60 = vpop.f32.mrf.mxu3  ;;  %v1920_v55 = vpop.f32.mrf.mxu1 }
 0x1f6   : > { %v2341_v46 = vadd.f32 %v2261_v60, %v2157_v3  ;;  %v1997_v35 = vadd.f32 %v1920_v55, %v4690_v59  ;;  %v4694_v55 = vld [vmem:[#allocation32_spill] sm:$0xff] }
 0x1f7   : > { %3190 = vmatmul.msk.bf16.gmra.mxu0 %vm753_vm3, %v4071_v2 }
 0x1f8   : > { %v2509_v22 = vadd.f32 %v2429_v48, %v2341_v46  ;;  %v2079_v24 = vpop.f32.mrf.mxu2  ;;  %3066 = vmatmul.msk.bf16.gmra.mxu1 %vm753_vm3, %v4071_v2 }
 0x1f9   : > { %v2158_v53 = vadd.f32 %v2079_v24, %v1996_v16  ;;  %v4695_v24 = vld [vmem:[#allocation12_spill] sm:$0xff] }
 0x1fa   : > { %v2545_v29 = vadd.f32 %v4373_v33, %v2509_v22 }
 0x1fc   : > { %v2577_v54 = vmax.f32 %v2545_v29, 0.0  ;;  %v2431_v1 = vpop.f32.mrf.mxu0 }
 0x1fd   : > { %v2263_v0 = vpop.f32.mrf.mxu3  ;;  %3110 = vmatmul.msk.bf16.gmra.mxu2 %vm753_vm3, %v4078_v20  ;;  %v1922_v17 = vpop.f32.mrf.mxu1 }
 0x1fe   : > { %2609 = vst [vmem:[%s4385_s4] sm:$0xff] %v2577_v54  ;;  %v2342_v44 = vadd.f32 %v2263_v0, %v2158_v53  ;;  %v1998_v10 = vadd.f32 %v1922_v17, %v4693_v49 }
 0x200   : > { %v2510_v2 = vadd.f32 %v2431_v1, %v2342_v44  ;;  %v2082_v14 = vpop.f32.mrf.mxu2  ;;  %v4696_v1 = vld [vmem:[#allocation3_spill] sm:$0xff] }
 0x201   : > { %v2159_v57 = vadd.f32 %v2082_v14, %v1997_v35  ;;  %v4697_v14 = vld [vmem:[#allocation35_spill] sm:$0xff] }
 0x202   : > { %v2546_v41 = vadd.f32 %v4373_v33, %v2510_v2  ;;  %3150 = vmatmul.msk.bf16.gmra.mxu3 %vm753_vm3, %v4691_v36  ;;  %v4698_v36 = vld [vmem:[#allocation33_spill] sm:$0xff] }
 0x204   : > { %v2578_v50 = vmax.f32 %v2546_v41, 0.0  ;;  %v2434_v31 = vpop.f32.mrf.mxu0 }
 0x205   : > { %v2266_v13 = vpop.f32.mrf.mxu3  ;;  %v1925_v37 = vpop.f32.mrf.mxu1 }
 0x206   : > { %2610 = vst [vmem:[%s4385_s4 + $0x8] sm:$0xff] %v2578_v50  ;;  %v2343_v20 = vadd.f32 %v2266_v13, %v2159_v57  ;;  %v1999_v29 = vadd.f32 %v1925_v37, %v4695_v24 }
 0x207   : > { %3191 = vmatmul.msk.bf16.gmra.mxu0 %vm753_vm3, %v4692_v26 }
 0x208   : > { %v2511_v4 = vadd.f32 %v2434_v31, %v2343_v20  ;;  %v2084_v23 = vpop.f32.mrf.mxu2  ;;  %3067 = vmatmul.msk.bf16.gmra.mxu1 %vm753_vm3, %v4692_v26 }
 0x209   : > { %v2160_v30 = vadd.f32 %v2084_v23, %v1998_v10 }
 0x20a   : > { %v2547_v34 = vadd.f32 %v4373_v33, %v2511_v4  ;;  %v4699_v4 = vld [vmem:[#allocation36_spill] sm:$0xff] }
 0x20c   : > { %v2579_v3 = vmax.f32 %v2547_v34, 0.0  ;;  %v2436_v48 = vpop.f32.mrf.mxu0  ;;  %v4700_v34 = vld [vmem:[#allocation34_spill] sm:$0xff] }
 0x20d   : > { %v2268_v60 = vpop.f32.mrf.mxu3  ;;  %3111 = vmatmul.msk.bf16.gmra.mxu2 %vm753_vm3, %v4694_v55  ;;  %v1927_v46 = vpop.f32.mrf.mxu1 }
 0x20e   : > { %2611 = vst [vmem:[%s4385_s4 + $0x10] sm:$0xff] %v2579_v3  ;;  %v2344_v22 = vadd.f32 %v2268_v60, %v2160_v30  ;;  %v2000_v57 = vadd.f32 %v1927_v46, %v4698_v36  ;;  %v4701_v60 = vld [vmem:[#allocation4_spill] sm:$0xff] }
 0x210   : > { %v2512_v16 = vadd.f32 %v2436_v48, %v2344_v22  ;;  %v2087_v53 = vpop.f32.mrf.mxu2 }
 0x211   : > { %v2161_v0 = vadd.f32 %v2087_v53, %v1999_v29  ;;  %v4702_v53 = vld [vmem:[#allocation39_spill] sm:$0xff] }
 0x212   : > { %v2548_v54 = vadd.f32 %v4373_v33, %v2512_v16  ;;  %3151 = vmatmul.msk.bf16.gmra.mxu3 %vm753_vm3, %v4696_v1  ;;  %v4703_v1 = vld [vmem:[#allocation37_spill] sm:$0xff] }
 0x214   : > { %v2580_v17 = vmax.f32 %v2548_v54, 0.0  ;;  %v2439_v44 = vpop.f32.mrf.mxu0 }
 0x215   : > { %v2271_v2 = vpop.f32.mrf.mxu3  ;;  %v1930_v59 = vpop.f32.mrf.mxu1 }
 0x216   : > { %2612 = vst [vmem:[%s4385_s4 + $0x18] sm:$0xff] %v2580_v17  ;;  %v2345_v35 = vadd.f32 %v2271_v2, %v2161_v0  ;;  %v2001_v30 = vadd.f32 %v1930_v59, %v4700_v34 }
 0x217   : > { %3192 = vmatmul.msk.bf16.gmra.mxu0 %vm753_vm3, %v4697_v14 }
 0x218   : > { %v2513_v41 = vadd.f32 %v2439_v44, %v2345_v35  ;;  %v2089_v50 = vpop.f32.mrf.mxu2  ;;  %3068 = vmatmul.msk.bf16.gmra.mxu1 %vm753_vm3, %v4697_v14 }
 0x219   : > { %v2162_v13 = vadd.f32 %v2089_v50, %v2000_v57 }
 0x21a   : > { %v2549_v31 = vadd.f32 %v4373_v33, %v2513_v41  ;;  %v4704_v41 = vld [vmem:[#allocation6_spill] sm:$0xff] }
 0x21c   : > { %v2581_v37 = vmax.f32 %v2549_v31, 0.0  ;;  %v2441_v20 = vpop.f32.mrf.mxu0  ;;  %v4705_v31 = vld [vmem:[#allocation38_spill] sm:$0xff] }
 0x21d   : > { %v2273_v26 = vpop.f32.mrf.mxu3  ;;  %3112 = vmatmul.msk.bf16.gmra.mxu2 %vm753_vm3, %v4699_v4  ;;  %v1932_v49 = vpop.f32.mrf.mxu1 }
 0x21e   : > { %2613 = vst [vmem:[%s4385_s4 + $0x20] sm:$0xff] %v2581_v37  ;;  %v2346_v10 = vadd.f32 %v2273_v26, %v2162_v13  ;;  %v2002_v0 = vadd.f32 %v1932_v49, %v4703_v1  ;;  %v4706_v26 = vld [vmem:[#allocation10_spill] sm:$0xff] }
 0x220   : > { %v2514_v23 = vadd.f32 %v2441_v20, %v2346_v10  ;;  %v2092_v3 = vpop.f32.mrf.mxu2 }
 0x221   : > { %v2163_v55 = vadd.f32 %v2092_v3, %v2001_v30  ;;  %v4707_v3 = vld [vmem:[#allocation41_spill] sm:$0xff] }
 0x222   : > { %v2550_v48 = vadd.f32 %v4373_v33, %v2514_v23  ;;  %3152 = vmatmul.msk.bf16.gmra.mxu3 %vm753_vm3, %v4701_v60  ;;  %v4708_v60 = vld [vmem:[#allocation7_spill] sm:$0xff] }
 0x224   : > { %v2582_v46 = vmax.f32 %v2550_v48, 0.0  ;;  %v2444_v22 = vpop.f32.mrf.mxu0 }
 0x225   : > { %v2276_v16 = vpop.f32.mrf.mxu3  ;;  %v1935_v24 = vpop.f32.mrf.mxu1 }
 0x226   : > { %2614 = vst [vmem:[%s4385_s4 + $0x28] sm:$0xff] %v2582_v46  ;;  %v2347_v29 = vadd.f32 %v2276_v16, %v2163_v55  ;;  %v2003_v13 = vadd.f32 %v1935_v24, %v4705_v31 }
 0x227   : > { %3193 = vmatmul.msk.bf16.gmra.mxu0 %vm753_vm3, %v4702_v53 }
 0x228   : > { %v2515_v54 = vadd.f32 %v2444_v22, %v2347_v29  ;;  %v2094_v17 = vpop.f32.mrf.mxu2  ;;  %3069 = vmatmul.msk.bf16.gmra.mxu1 %vm753_vm3, %v4702_v53 }
 0x229   : > { %v2164_v2 = vadd.f32 %v2094_v17, %v2002_v0  ;;  %v4709_v17 = vld [vmem:[#allocation40_spill] sm:$0xff] }
 0x22a   : > { %v2551_v44 = vadd.f32 %v4373_v33, %v2515_v54 }
 0x22c   : > { %v2583_v59 = vmax.f32 %v2551_v44, 0.0  ;;  %v2446_v35 = vpop.f32.mrf.mxu0 }
 0x22d   : > { %v2278_v14 = vpop.f32.mrf.mxu3  ;;  %3113 = vmatmul.msk.bf16.gmra.mxu2 %vm753_vm3, %v4704_v41  ;;  %v1937_v36 = vpop.f32.mrf.mxu1 }
 0x22e   : > { %2615 = vst [vmem:[%s4385_s4 + $0x30] sm:$0xff] %v2583_v59  ;;  %v2348_v57 = vadd.f32 %v2278_v14, %v2164_v2  ;;  %v2004_v55 = vadd.f32 %v1937_v36, %v4708_v60  ;;  %v4710_v36 = vld [vmem:[#allocation42_spill] sm:$0xff] }
 0x230   : > { %v2516_v50 = vadd.f32 %v2446_v35, %v2348_v57  ;;  %v2097_v37 = vpop.f32.mrf.mxu2  ;;  %v1862_v57 = vrot.slane %v4710_v36, 5 }
 0x231   : > { %v2165_v4 = vadd.f32 %v2097_v37, %v2003_v13 }
 0x232   : > { %v2552_v20 = vadd.f32 %v4373_v33, %v2516_v50  ;;  %3153 = vmatmul.msk.bf16.gmra.mxu3 %vm753_vm3, %v4706_v26  ;;  %v4452_v50 = vld [vmem:[%s3379_s25 + $0xcc] sm:$0xf] }
 0x234   : > { %v2584_v49 = vmax.f32 %v2552_v20, 0.0  ;;  %v2449_v10 = vpop.f32.mrf.mxu0  ;;  %v4711_v20 = vld [vmem:[#allocation5_spill] sm:$0xff] }
 0x235   : > { %v2281_v23 = vpop.f32.mrf.mxu3  ;;  %v1940_v34 = vpop.f32.mrf.mxu1  ;;  %v3032_v26 = vrot.slane %v4711_v20, 9 }
 0x236   : > { %2616 = vst [vmem:[%s4385_s4 + $0x38] sm:$0xff] %v2584_v49  ;;  %v2349_v30 = vadd.f32 %v2281_v23, %v2165_v4  ;;  %v2005_v44 = vadd.f32 %v1940_v34, %v4709_v17  ;;  %v2193_v4 = vshll.u32 %v4452_v50, 16 }
 0x237   : > { %3194 = vmatmul.msk.bf16.gmra.mxu0 %vm753_vm3, %v4707_v3 }
 0x238   : > { %v2517_v48 = vadd.f32 %v2449_v10, %v2349_v30  ;;  %v2099_v46 = vpop.f32.mrf.mxu2  ;;  %3070 = vmatmul.msk.bf16.gmra.mxu1 %vm753_vm3, %v4707_v3  ;;  %v1864_v3 = vrot.slane %v1862_v57, 4 }
 0x239   : > { %v2166_v16 = vadd.f32 %v2099_v46, %v2004_v55  ;;  %v1863_v46 = vsel %vm3755_vm6, %v3032_v26, %v1862_v57 }
 0x23a   : > { %v2553_v22 = vadd.f32 %v4373_v33, %v2517_v48  ;;  %v1865_v48 = vrot.slane %v4210_v28, 5  ;;  %v1876_v17 = vunpack.c.l.b16 %v1863_v46 }
 0x23c   : > { %v2585_v24 = vmax.f32 %v2553_v22, 0.0  ;;  %v2451_v29 = vpop.f32.mrf.mxu0 }
 0x23d   : > { %v2283_v53 = vpop.f32.mrf.mxu3  ;;  %3114 = vmatmul.msk.bf16.gmra.mxu2 %vm753_vm3, %v4203_v47  ;;  %v1942_v54 = vpop.f32.mrf.mxu1  ;;  %v4455_v47 = vld [vmem:[%s3379_s25 + $0xd0] sm:$0xf] }
 0x23e   : > { %2617 = vst [vmem:[%s4385_s4 + $0x40] sm:$0xff] %v2585_v24  ;;  %v2350_v1 = vadd.f32 %v2283_v53, %v2166_v16  ;;  %v2199_v49 = vshll.u32 %v4455_v47, 16  ;;  %v2203_v10 = vshrl.u32 %v4455_v47, 16  ;;  %v2006_v34 = vadd.f32 %v1942_v54, %v4207_v27 }
 0x23f   : > { %v2195_v16 = vrot.slane %v2193_v4, 5  ;;  %v1866_v54 = vsel %vm3755_vm6, %v1864_v3, %v1865_v48 }
 0x240   : > { %v2518_v0 = vadd.f32 %v2451_v29, %v2350_v1  ;;  %v2102_v2 = vpop.f32.mrf.mxu2  ;;  %v2201_v24 = vrot.slane %v2199_v49, 5  ;;  %v2205_v29 = vrot.slane %v2203_v10, 4  ;;  %v2376_v49 = vrot.slane %v4455_v47, 5 }
 0x241   : > { %v2167_v35 = vadd.f32 %v2102_v2, %v2005_v44  ;;  %v1877_v44 = vunpack.c.l.b16 %v1866_v54 }
 0x242   : > { %v2554_v59 = vadd.f32 %v4373_v33, %v2518_v0  ;;  %3154 = vmatmul.msk.bf16.gmra.mxu3 %vm753_vm3, %v3764_v12  ;;  %v2190_v12 = vshrl.u32 %v4452_v50, 16  ;;  %v2378_v47 = vrot.slane %v2376_v49, 4 }
 0x244   : > { %v2586_v14 = vmax.f32 %v2554_v59, 0.0  ;;  %v2454_v41 = vpop.f32.mrf.mxu0  ;;  %v2192_v22 = vrot.slane %v2190_v12, 4  ;;  %v2206_v59 = vor.u32 %v2205_v29, %v2201_v24 }
 0x245   : > { %v2286_v31 = vpop.f32.mrf.mxu3  ;;  %v1945_v13 = vpop.f32.mrf.mxu1 }
 0x246   : > { %2618 = vst [vmem:[%s4385_s4 + $0x48] sm:$0xff] %v2586_v14  ;;  %v2351_v37 = vadd.f32 %v2286_v31, %v2167_v35  ;;  %v2196_v2 = vor.u32 %v2195_v16, %v2192_v22  ;;  %v2207_v20 = vrot.slane %v2206_v59, 4 }
 0x247   : > { %3195 = vmatmul.msk.bf16.gmra.mxu0 %vm753_vm3, %v4226_v19 }
 0x248   : > { %v2519_v23 = vadd.f32 %v2454_v41, %v2351_v37  ;;  %v2104_v30 = vpop.f32.mrf.mxu2  ;;  %3071 = vmatmul.msk.bf16.gmra.mxu1 %vm753_vm3, %v4226_v19  ;;  %v276_v19 = vld [vmem:[%s3379_s25 + $0xd4] sm:$0x1]  ;;  %v2007_v41 = vadd.f32 %v1945_v13, %v4224_v56  ;;  %v2197_v37 = vrot.slane %v2196_v2, 4 }
 0x249   : > { %v2168_v55 = vadd.f32 %v2104_v30, %v2006_v34  ;;  %v2209_v35 = vshll.u32 %v276_v19, 16  ;;  %v3157_v34 = vrot.slane %v4452_v50, 9 }
 0x24a   : > { %v2555_v60 = vadd.f32 %v4373_v33, %v2519_v23  ;;  %v2202_v13 = vsel %vm3411_vm2, %v2197_v37, %v2201_v24 }
 0x24b   : > { %v2211_v26 = vrot.slane %v2209_v35, 5  ;;  %v2222_v16 = vunpack.c.l.b16 %v2202_v13  ;;  %v2377_v50 = vsel %vm3755_vm6, %v3157_v34, %v2376_v49 }
 0x24c   : > { %v2587_v53 = vmax.f32 %v2555_v60, 0.0  ;;  %v2456_v27 = vpop.f32.mrf.mxu0  ;;  %v2379_v60 = vrot.slane %v276_v19, 5 }
 0x24d   : > { %v2288_v1 = vpop.f32.mrf.mxu3  ;;  %3115 = vmatmul.msk.bf16.gmra.mxu2 %vm753_vm3, %v4235_v42  ;;  %v1947_v28 = vpop.f32.mrf.mxu1  ;;  %v1878_v42 = vpack.c.b16 %v1877_v44, %v1876_v17 }
 0x24e   : > { %2619 = vst [vmem:[%s4385_s4 + $0x50] sm:$0xff] %v2587_v53  ;;  %v2352_v0 = vadd.f32 %v2288_v1, %v2168_v55  ;;  %v2008_v3 = vadd.f32 %v1947_v28, %v4238_v51  ;;  %v3218_v55 = vld [vmem:[%s3379_s25 + $0xcc] sm:$0xff]  ;;  %v2380_v51 = vsel %vm3755_vm6, %v2378_v47, %v2379_v60  ;;  %v2390_v1 = vunpack.c.l.b16 %v2377_v50 }
 0x24f   : > { %v2391_v28 = vunpack.c.l.b16 %v2380_v51 }
 0x250   : > { %v2520_v14 = vadd.f32 %v2456_v27, %v2352_v0  ;;  %v2107_v36 = vpop.f32.mrf.mxu2 }
 0x251   : > { %v2169_v31 = vadd.f32 %v2107_v36, %v2007_v41  ;;  %v2392_v59 = vpack.c.b16 %v2391_v28, %v2390_v1 }
 0x252   : > { %v2556_v57 = vadd.f32 %v4373_v33, %v2520_v14  ;;  %3155 = vmatmul.msk.bf16.gmra.mxu3 %vm753_vm3, %v4242_v21  ;;  %v2212_v21 = vsel %vm3411_vm2, %v2207_v20, %v2211_v26 }
 0x253   : > { %v2223_v24 = vunpack.c.l.b16 %v2212_v21 }
 0x254   : > { %v2588_v12 = vmax.f32 %v2556_v57, 0.0  ;;  %v2459_v4 = vpop.f32.mrf.mxu0 }
 0x255   : > { %v2291_v10 = vpop.f32.mrf.mxu3  ;;  %v1950_v23 = vpop.f32.mrf.mxu1  ;;  %v2224_v19 = vpack.c.b16 %v2223_v24, %v2222_v16 }
 0x256   : > { %2620 = vst [vmem:[%s4385_s4 + $0x58] sm:$0xff] %v2588_v12  ;;  %v2353_v56 = vadd.f32 %v2291_v10, %v2169_v31  ;;  %v2009_v17 = vadd.f32 %v1950_v23, %v4249_v8 }
 0x257   : > { %3196 = vmatmul.msk.bf16.gmra.mxu0 %vm753_vm3, %v1878_v42 }
 0x258   : > { %v2521_v30 = vadd.f32 %v2459_v4, %v2353_v56  ;;  %v2109_v48 = vpop.f32.mrf.mxu2  ;;  %3072 = vmatmul.msk.bf16.gmra.mxu1 %vm753_vm3, %v1878_v42 }
 0x259   : > { %v2170_v22 = vadd.f32 %v2109_v48, %v2008_v3 }
 0x25a   : > { %v2557_v46 = vadd.f32 %v4373_v33, %v2521_v30 }
 0x25c   : > { %v2589_v29 = vmax.f32 %v2557_v46, 0.0  ;;  %v2461_v32 = vpop.f32.mrf.mxu0 }
 0x25d   : > { %v2293_v53 = vpop.f32.mrf.mxu3  ;;  %3116 = vmatmul.msk.bf16.gmra.mxu2 %vm753_vm3, %v3218_v55  ;;  %v1952_v27 = vpop.f32.mrf.mxu1 }
 0x25e   : > { %2621 = vst [vmem:[%s4385_s4 + $0x60] sm:$0xff] %v2589_v29  ;;  %v2354_v54 = vadd.f32 %v2293_v53, %v2170_v22  ;;  %v2010_v42 = vadd.f32 %v1952_v27, %v4254_v15 }
 0x260   : > { %v2522_v0 = vadd.f32 %v2461_v32, %v2354_v54  ;;  %v2112_v44 = vpop.f32.mrf.mxu2 }
 0x261   : > { %v2171_v7 = vadd.f32 %v2112_v44, %v2009_v17 }
 0x262   : > { %v2558_v2 = vadd.f32 %v4373_v33, %v2522_v0  ;;  %3156 = vmatmul.msk.bf16.gmra.mxu3 %vm753_vm3, %v2224_v19 }
 0x264   : > { %v2590_v35 = vmax.f32 %v2558_v2, 0.0  ;;  %v2464_v14 = vpop.f32.mrf.mxu0 }
 0x265   : > { %v2296_v41 = vpop.f32.mrf.mxu3  ;;  %v1955_v36 = vpop.f32.mrf.mxu1 }
 0x266   : > { %2622 = vst [vmem:[%s4385_s4 + $0x68] sm:$0xff] %v2590_v35  ;;  %v2355_v57 = vadd.f32 %v2296_v41, %v2171_v7  ;;  %v2011_v56 = vadd.f32 %v1955_v36, %v4263_v43 }
 0x267   : > { %3197 = vmatmul.msk.bf16.gmra.mxu0 %vm753_vm3, %v2392_v59 }
 0x268   : > { %v2523_v31 = vadd.f32 %v2464_v14, %v2355_v57  ;;  %v2114_v8 = vpop.f32.mrf.mxu2 }
 0x269   : > { %v2172_v20 = vadd.f32 %v2114_v8, %v2010_v42 }
 0x26a   : > { %v2559_v37 = vadd.f32 %v4373_v33, %v2523_v31 }
 0x26c   : > { %v2591_v26 = vmax.f32 %v2559_v37, 0.0  ;;  %v2466_v12 = vpop.f32.mrf.mxu0 }
 0x26d   : > { %v2298_v4 = vpop.f32.mrf.mxu3  ;;  %v1957_v49 = vpop.f32.mrf.mxu1 }
 0x26e   : > { %2623 = vst [vmem:[%s4385_s4 + $0x70] sm:$0xff] %v2591_v26  ;;  %v2356_v10 = vadd.f32 %v2298_v4, %v2172_v20  ;;  %v2012_v55 = vadd.f32 %v1957_v49, %v4268_v11 }
 0x270   : > { %v2524_v23 = vadd.f32 %v2466_v12, %v2356_v10  ;;  %v2117_v13 = vpop.f32.mrf.mxu2 }
 0x271   : > { %v2173_v34 = vadd.f32 %v2117_v13, %v2011_v56 }
 0x272   : > { %v2560_v21 = vadd.f32 %v4373_v33, %v2524_v23 }
 0x274   : > { %v2592_v15 = vmax.f32 %v2560_v21, 0.0  ;;  %v2469_v30 = vpop.f32.mrf.mxu0 }
 0x275   : > { %v2301_v3 = vpop.f32.mrf.mxu3  ;;  %v1960_v48 = vpop.f32.mrf.mxu1 }
 0x276   : > { %2624 = vst [vmem:[%s4385_s4 + $0x78] sm:$0xff] %v2592_v15  ;;  %v2357_v47 = vadd.f32 %v2301_v3, %v2173_v34  ;;  %v2013_v53 = vadd.f32 %v1960_v48, %v4277_v58 }
 0x278   : > { %v2525_v60 = vadd.f32 %v2469_v30, %v2357_v47  ;;  %v2119_v46 = vpop.f32.mrf.mxu2 }
 0x279   : > { %v2174_v16 = vadd.f32 %v2119_v46, %v2012_v55 }
 0x27a   : > { %v2561_v22 = vadd.f32 %v4373_v33, %v2525_v60 }
 0x27c   : > { %v2593_v43 = vmax.f32 %v2561_v22, 0.0  ;;  %v2471_v24 = vpop.f32.mrf.mxu0 }
 0x27d   : > { %v2303_v29 = vpop.f32.mrf.mxu3  ;;  %v1962_v32 = vpop.f32.mrf.mxu1 }
 0x27e   : > { %2625 = vst [vmem:[%s4385_s4 + $0x80] sm:$0xff] %v2593_v43  ;;  %v2358_v50 = vadd.f32 %v2303_v29, %v2174_v16  ;;  %v2014_v2 = vadd.f32 %v1962_v32, %v4282_v25 }
 0x280   : > { %v2526_v51 = vadd.f32 %v2471_v24, %v2358_v50  ;;  %v2122_v27 = vpop.f32.mrf.mxu2 }
 0x281   : > { %v2175_v19 = vadd.f32 %v2122_v27, %v2013_v53 }
 0x282   : > { %v2562_v54 = vadd.f32 %v4373_v33, %v2526_v51 }
 0x284   : > { %v2594_v11 = vmax.f32 %v2562_v54, 0.0  ;;  %v2474_v1 = vpop.f32.mrf.mxu0 }
 0x285   : > { %v2306_v28 = vpop.f32.mrf.mxu3  ;;  %v1965_v0 = vpop.f32.mrf.mxu1 }
 0x286   : > { %2626 = vst [vmem:[%s4385_s4 + $0x88] sm:$0xff] %v2594_v11  ;;  %v2359_v17 = vadd.f32 %v2306_v28, %v2175_v19  ;;  %v2015_v42 = vadd.f32 %v1965_v0, %v4291_v18 }
 0x288   : > { %v2527_v44 = vadd.f32 %v2474_v1, %v2359_v17  ;;  %v2124_v7 = vpop.f32.mrf.mxu2 }
 0x289   : > { %v2176_v35 = vadd.f32 %v2124_v7, %v2014_v2 }
 0x28a   : > { %v2563_v59 = vadd.f32 %v4373_v33, %v2527_v44 }
 0x28c   : > { %v2595_v58 = vmax.f32 %v2563_v59, 0.0  ;;  %v2476_v14 = vpop.f32.mrf.mxu0 }
 0x28d   : > { %v2308_v41 = vpop.f32.mrf.mxu3  ;;  %v1967_v36 = vpop.f32.mrf.mxu1 }
 0x28e   : > { %2627 = vst [vmem:[%s4385_s4 + $0x90] sm:$0xff] %v2595_v58  ;;  %v2360_v57 = vadd.f32 %v2308_v41, %v2176_v35  ;;  %v2016_v23 = vadd.f32 %v1967_v36, %v4296_v39 }
 0x290   : > { %v2528_v31 = vadd.f32 %v2476_v14, %v2360_v57  ;;  %v2127_v8 = vpop.f32.mrf.mxu2 }
 0x291   : > { %v2177_v20 = vadd.f32 %v2127_v8, %v2015_v42 }
 0x292   : > { %v2564_v37 = vadd.f32 %v4373_v33, %v2528_v31 }
 0x294   : > { %v2596_v25 = vmax.f32 %v2564_v37, 0.0  ;;  %v2479_v26 = vpop.f32.mrf.mxu0 }
 0x295   : > { %v2311_v12 = vpop.f32.mrf.mxu3  ;;  %v1970_v4 = vpop.f32.mrf.mxu1 }
 0x296   : > { %2628 = vst [vmem:[%s4385_s4 + $0x98] sm:$0xff] %v2596_v25  ;;  %v2361_v49 = vadd.f32 %v2311_v12, %v2177_v20  ;;  %v2017_v47 = vadd.f32 %v1970_v4, %v4305_v45 }
 0x298   : > { %v2529_v10 = vadd.f32 %v2479_v26, %v2361_v49  ;;  %v2129_v56 = vpop.f32.mrf.mxu2 }
 0x299   : > { %v2178_v21 = vadd.f32 %v2129_v56, %v2016_v23 }
 0x29a   : > { %v2565_v13 = vadd.f32 %v4373_v33, %v2529_v10 }
 0x29c   : > { %v2597_v18 = vmax.f32 %v2565_v13, 0.0  ;;  %v2481_v34 = vpop.f32.mrf.mxu0 }
 0x29d   : > { %v2313_v15 = vpop.f32.mrf.mxu3  ;;  %v1972_v30 = vpop.f32.mrf.mxu1 }
 0x29e   : > { %2629 = vst [vmem:[%s4385_s4 + $0xa0] sm:$0xff] %v2597_v18  ;;  %v2362_v3 = vadd.f32 %v2313_v15, %v2178_v21  ;;  %v2018_v32 = vadd.f32 %v1972_v30, %v4310_v61 }
 0x2a0   : > { %v2530_v48 = vadd.f32 %v2481_v34, %v2362_v3  ;;  %v2132_v60 = vpop.f32.mrf.mxu2 }
 0x2a1   : > { %v2179_v46 = vadd.f32 %v2132_v60, %v2017_v47 }
 0x2a2   : > { %v2566_v55 = vadd.f32 %v4373_v33, %v2530_v48 }
 0x2a4   : > { %v2598_v39 = vmax.f32 %v2566_v55, 0.0  ;;  %v2484_v22 = vpop.f32.mrf.mxu0 }
 0x2a5   : > { %v2316_v16 = vpop.f32.mrf.mxu3  ;;  %v1975_v43 = vpop.f32.mrf.mxu1 }
 0x2a6   : > { %2630 = vst [vmem:[%s4385_s4 + $0xa8] sm:$0xff] %v2598_v39  ;;  %v2363_v24 = vadd.f32 %v2316_v16, %v2179_v46  ;;  %v2019_v28 = vadd.f32 %v1975_v43, %v4319_v6 }
 0x2a8   : > { %v2531_v29 = vadd.f32 %v2484_v22, %v2363_v24  ;;  %v2134_v50 = vpop.f32.mrf.mxu2 }
 0x2a9   : > { %v2180_v53 = vadd.f32 %v2134_v50, %v2018_v32 }
 0x2aa   : > { %v2567_v51 = vadd.f32 %v4373_v33, %v2531_v29 }
 0x2ac   : > { %v2599_v45 = vmax.f32 %v2567_v51, 0.0  ;;  %v2486_v27 = vpop.f32.mrf.mxu0 }
 0x2ad   : > { %v2318_v54 = vpop.f32.mrf.mxu3  ;;  %v1977_v19 = vpop.f32.mrf.mxu1 }
 0x2ae   : > { %2631 = vst [vmem:[%s4385_s4 + $0xb0] sm:$0xff] %v2599_v45  ;;  %v2364_v11 = vadd.f32 %v2318_v54, %v2180_v53  ;;  %v2020_v14 = vadd.f32 %v1977_v19, %v4324_v5 }
 0x2b0   : > { %v2532_v1 = vadd.f32 %v2486_v27, %v2364_v11  ;;  %v2137_v0 = vpop.f32.mrf.mxu2 }
 0x2b1   : > { %v2181_v44 = vadd.f32 %v2137_v0, %v2019_v28 }
 0x2b2   : > { %v2568_v17 = vadd.f32 %v4373_v33, %v2532_v1 }
 0x2b4   : > { %v2600_v61 = vmax.f32 %v2568_v17, 0.0  ;;  %v2489_v2 = vpop.f32.mrf.mxu0 }
 0x2b5   : > { %v2321_v7 = vpop.f32.mrf.mxu3  ;;  %v1980_v59 = vpop.f32.mrf.mxu1 }
 0x2b6   : > { %2632 = vst [vmem:[%s4385_s4 + $0xb8] sm:$0xff] %v2600_v61  ;;  %v2365_v35 = vadd.f32 %v2321_v7, %v2181_v44  ;;  %v2021_v25 = vadd.f32 %v1980_v59, %v4333_v9 }
 0x2b8   : > { %v2533_v58 = vadd.f32 %v2489_v2, %v2365_v35  ;;  %v2139_v41 = vpop.f32.mrf.mxu2 }
 0x2b9   : > { %v2182_v57 = vadd.f32 %v2139_v41, %v2020_v14 }
 0x2ba   : > { %v2569_v36 = vadd.f32 %v4373_v33, %v2533_v58 }
 0x2bc   : > { %v2601_v6 = vmax.f32 %v2569_v36, 0.0  ;;  %v2491_v31 = vpop.f32.mrf.mxu0 }
 0x2bd   : > { %v2323_v42 = vpop.f32.mrf.mxu3  ;;  %v1982_v8 = vpop.f32.mrf.mxu1 }
 0x2be   : > { %2633 = vst [vmem:[%s4385_s4 + $0xc0] sm:$0xff] %v2601_v6  ;;  %v2366_v37 = vadd.f32 %v2323_v42, %v2182_v57  ;;  %v2022_v21 = vadd.f32 %v1982_v8, %v4338_v63 }
 0x2c0   : > { %v2534_v20 = vadd.f32 %v2491_v31, %v2366_v37  ;;  %v2142_v26 = vpop.f32.mrf.mxu2 }
 0x2c1   : > { %v2183_v4 = vadd.f32 %v2142_v26, %v2021_v25 }
 0x2c2   : > { %v2570_v12 = vadd.f32 %v4373_v33, %v2534_v20 }
 0x2c4   : > { %v2602_v5 = vmax.f32 %v2570_v12, 0.0  ;;  %v2494_v49 = vpop.f32.mrf.mxu0 }
 0x2c5   : > { %v2326_v10 = vpop.f32.mrf.mxu3  ;;  %v1985_v56 = vpop.f32.mrf.mxu1 }
 0x2c6   : > { %2634 = vst [vmem:[%s4385_s4 + $0xc8] sm:$0xff] %v2602_v5  ;;  %v2367_v23 = vadd.f32 %v2326_v10, %v2183_v4  ;;  %v2023_v60 = vadd.f32 %v1985_v56, %v4347_v40 }
 0x2c8   : > { %v2535_v13 = vadd.f32 %v2494_v49, %v2367_v23  ;;  %v2144_v18 = vpop.f32.mrf.mxu2 }
 0x2c9   : > { %v2184_v15 = vadd.f32 %v2144_v18, %v2022_v21 }
 0x2ca   : > { %v2571_v34 = vadd.f32 %v4373_v33, %v2535_v13 }
 0x2cc   : > { %v2603_v9 = vmax.f32 %v2571_v34, 0.0  ;;  %v2496_v30 = vpop.f32.mrf.mxu0 }
 0x2cd   : > { %v2328_v3 = vpop.f32.mrf.mxu3  ;;  %v1987_v46 = vpop.f32.mrf.mxu1 }
 0x2ce   : > { %2635 = vst [vmem:[%s4385_s4 + $0xd0] sm:$0xff] %v2603_v9  ;;  %v2368_v48 = vadd.f32 %v2328_v3, %v2184_v15  ;;  %v2024_v32 = vadd.f32 %v1987_v46, %v4352_v38 }
 0x2d0   : > { %v2536_v47 = vadd.f32 %v2496_v30, %v2368_v48  ;;  %v2147_v55 = vpop.f32.mrf.mxu2 }
 0x2d1   : > { %v2185_v22 = vadd.f32 %v2147_v55, %v2023_v60 }
 0x2d2   : > { %v2572_v39 = vadd.f32 %v4373_v33, %v2536_v47 }
 0x2d4   : > { %v2604_v63 = vmax.f32 %v2572_v39, 0.0  ;;  %v2499_v16 = vpop.f32.mrf.mxu0 }
 0x2d5   : > { %v2331_v43 = vpop.f32.mrf.mxu3  ;;  %v1990_v40 = vpop.f32.mrf.mxu1 }
 0x2d6   : > { %2636 = vst [vmem:[%s4385_s4 + $0xd8] sm:$0xff] %v2604_v63  ;;  %v2369_v24 = vadd.f32 %v2331_v43, %v2185_v22  ;;  %v2025_v1 = vadd.f32 %v1990_v40, %v4361_v62 }
 0x2d8   : > { %v2537_v29 = vadd.f32 %v2499_v16, %v2369_v24  ;;  %v2149_v50 = vpop.f32.mrf.mxu2 }
 0x2d9   : > { %v2186_v53 = vadd.f32 %v2149_v50, %v2024_v32 }
 0x2da   : > { %v2573_v51 = vadd.f32 %v4373_v33, %v2537_v29 }
 0x2dc   : > { %v2605_v45 = vmax.f32 %v2573_v51, 0.0  ;;  %v2501_v27 = vpop.f32.mrf.mxu0 }
 0x2dd   : > { %v2333_v54 = vpop.f32.mrf.mxu3  ;;  %v1992_v44 = vpop.f32.mrf.mxu1 }
 0x2de   : > { %2637 = vst [vmem:[%s4385_s4 + $0xe0] sm:$0xff] %v2605_v45  ;;  %v2370_v19 = vadd.f32 %v2333_v54, %v2186_v53  ;;  %v2026_v35 = vadd.f32 %v1992_v44, %v4366_v52 }
 0x2e0   : > { %v2538_v11 = vadd.f32 %v2501_v27, %v2370_v19  ;;  %v2152_v28 = vpop.f32.mrf.mxu2 }
 0x2e1   : > { %v2187_v17 = vadd.f32 %v2152_v28, %v2025_v1 }
 0x2e2   : > { %v2574_v0 = vadd.f32 %v4373_v33, %v2538_v11 }
 0x2e4   : > { %v2606_v38 = vmax.f32 %v2574_v0, 0.0  ;;  %v2504_v61 = vpop.f32.mrf.mxu0 }
 0x2e5   : > { %v2336_v2 = vpop.f32.mrf.mxu3 }
 0x2e6   : > { %2638 = vst [vmem:[%s4385_s4 + $0xe8] sm:$0xff] %v2606_v38  ;;  %v2371_v7 = vadd.f32 %v2336_v2, %v2187_v17 }
 0x2e8   : > { %v2539_v59 = vadd.f32 %v2504_v61, %v2371_v7  ;;  %v2154_v58 = vpop.f32.mrf.mxu2 }
 0x2e9   : > { %v2188_v41 = vadd.f32 %v2154_v58, %v2026_v35 }
 0x2ea   : > { %v2575_v14 = vadd.f32 %v4373_v33, %v2539_v59 }
 0x2ec   : > { %v2607_v62 = vmax.f32 %v2575_v14, 0.0  ;;  %v2506_v6 = vpop.f32.mrf.mxu0 }
 0x2ed   : > { %v2338_v36 = vpop.f32.mrf.mxu3 }
 0x2ee   : > { %2639 = vst [vmem:[%s4385_s4 + $0xf0] sm:$0xff] %v2607_v62  ;;  %v2372_v57 = vadd.f32 %v2338_v36, %v2188_v41 }
 0x2f0   : > { %v2540_v31 = vadd.f32 %v2506_v6, %v2372_v57 }
 0x2f2   : > { %v2576_v42 = vadd.f32 %v4373_v33, %v2540_v31 }
 0x2f4   : > { %v2608_v8 = vmax.f32 %v2576_v42, 0.0 }
 0x2f6   : > { %2640 = vst [vmem:[%s4385_s4 + $0xf8] sm:$0xff] %v2608_v8 }
 0x2f7 PF: > { %s13_s14 = sadd.s32 1, %s3324_s14   ;;  %s4712_s12 = smov %s3320_s13 }
 0x2f8   : > { %p10_p5 = scmp.ge.s32.totalorder %s13_s14, 4   ;;  %s4713_s13 = smov %s4715_s15 }
 0x2fa   :  { %12 = sbr.rel (!%p10_p5) target bundleno = 2 (0x2), region = 76 }

</bundles_post_ra>
